<compile_context>
chip_gen: v6e
topology: v6e:2x2x1
jax: 0.10.0
libtpu: 0.0.40
codegen_flags: <defaults>
</compile_context>

<pallas_src>
import functools

import jax
import jax.numpy as jnp
from jax.experimental import pallas as pl
from jax.experimental.pallas import tpu as pltpu  # noqa: F401  (kept for TPU-specific tuning)


# ---------------------------------------------------------------------------
# In-kernel helpers
# ---------------------------------------------------------------------------

def _lstm_cell(gates, c, hidden):
    """PyTorch gate order [i, f, g, o]. gates: (B, 4*hidden), c: (B, hidden)."""
    H = hidden
    i = jax.nn.sigmoid(gates[:, 0 * H:1 * H])
    f = jax.nn.sigmoid(gates[:, 1 * H:2 * H])
    g = jnp.tanh(gates[:, 2 * H:3 * H])
    o = jax.nn.sigmoid(gates[:, 3 * H:4 * H])
    c_new = f * c + i * g
    h_new = o * jnp.tanh(c_new)
    return h_new, c_new


# ---------------------------------------------------------------------------
# Fused whole-model kernel
# ---------------------------------------------------------------------------

def _lstm_model_kernel(xaug_ref, wx0_ref, wh0_ref, b0_ref,
                       wih1f_ref, whh1f_ref, b1f_ref, wih1b_ref, b1b_ref,
                       fcw_ref, fcb_ref, out_ref, *, seq, batch, hidden):
    """Entire LSTMModel forward (eval mode) in one kernel.

    xaug_ref : (T*B, 2*Din)  row t*B+b = [x[t, b] | x[T-1-t, b]]
    wx0_ref  : (2*Din, 8H)   layer-0 input weights, gate-interleaved block-diag
    wh0_ref  : (2H, 8H)      layer-0 recurrent weights, gate-interleaved block-diag
    b0_ref   : (1, 8H)       layer-0 folded bias (b_ih + b_hh), gate-interleaved
    wih1f/whh1f/b1f          layer-1 forward-direction weights (PyTorch layout, T)
    wih1b/b1b                layer-1 backward-direction input weights/bias
    fcw_ref  : (2H, O)       FC weight (transposed)
    fcb_ref  : (1, O)
    out_ref  : (B, O)        logits
    """
    T, B, H = seq, batch, hidden
    H2 = 2 * H

    # -------- Layer 0: both directions fused into one 2H-wide recurrence --------
    # Hoisted input projection + folded bias, one big MXU matmul for both
    # directions and all timesteps.
    gx0 = (jnp.dot(xaug_ref[...], wx0_ref[...], preferred_element_type=jnp.float32)
           + b0_ref[...])                                          # (T*B, 8H)

    h = jnp.zeros((B, H2), jnp.float32)                            # [h_fwd | h_bwd]
    c = jnp.zeros((B, H2), jnp.float32)
    h_steps = [None] * T
    for s in range(T):                    # fully unrolled (T is a compile-time const)
        gates = gx0[s * B:(s + 1) * B, :] + jnp.dot(
            h, wh0_ref[...], preferred_element_type=jnp.float32)   # (B, 8H)
        i = jax.nn.sigmoid(gates[:, 0 * H2:1 * H2])
        f = jax.nn.sigmoid(gates[:, 1 * H2:2 * H2])
        g = jnp.tanh(gates[:, 2 * H2:3 * H2])
        o = jax.nn.sigmoid(gates[:, 3 * H2:4 * H2])
        c = f * c + i * g
        h = o * jnp.tanh(c)
        h_steps[s] = h
    # h_steps[s][:, :H] = forward hidden at time s,
    # h_steps[s][:, H:] = backward hidden at time T-1-s.
    out0_rows = [jnp.concatenate([h_steps[t][:, :H], h_steps[T - 1 - t][:, H:]],
                                 axis=1) for t in range(T)]        # each (B, 2H)
    out0 = jnp.concatenate(out0_rows, axis=0)                      # (T*B, 2H), VMEM only
    # inter-layer dropout: identity in eval mode.

    # -------- Layer 1 (final): fwd recurrence only + single bwd step + FC --------
    gx1f = (jnp.dot(out0, wih1f_ref[...], preferred_element_type=jnp.float32)
            + b1f_ref[...])                                        # (T*B, 4H)
    hf = jnp.zeros((B, H), jnp.float32)
    cf = jnp.zeros((B, H), jnp.float32)
    for s in range(T):                    # fully unrolled
        gates_f = gx1f[s * B:(s + 1) * B, :] + jnp.dot(
            hf, whh1f_ref[...], preferred_element_type=jnp.float32)
        hf, cf = _lstm_cell(gates_f, cf, H)

    # Backward direction's hidden at t = T-1 is its FIRST step from zero state
    # (no Whh contribution), fed by out0 at time T-1.
    gates_b = (jnp.dot(out0_rows[T - 1], wih1b_ref[...],
                       preferred_element_type=jnp.float32) + b1b_ref[...])
    hb, _ = _lstm_cell(gates_b, jnp.zeros((B, H), jnp.float32), H)

    feat = jnp.concatenate([hf, hb], axis=1)                       # == lstm_out[:, -1, :]
    # dropout(feat): identity in eval mode.
    out_ref[...] = (jnp.dot(feat, fcw_ref[...], preferred_element_type=jnp.float32)
                    + fcb_ref[...])


# ---------------------------------------------------------------------------
# Wrapper-side weight layout helpers (one-time, plain XLA ops)
# ---------------------------------------------------------------------------

def _interleave_gate_cols(mat_f, mat_b, hidden):
    """Block-diagonal, gate-interleaved combine of two (R, 4H) weight matrices.

    Result (Rf+Rb, 8H) with column layout [i_f i_b | f_f f_b | g_f g_b | o_f o_b];
    rows 0:Rf only drive the *_f columns, rows Rf:Rf+Rb only drive *_b columns.
    """
    H = hidden
    rf, rb = mat_f.shape[0], mat_b.shape[0]
    zf = jnp.zeros((rf, H), jnp.float32)
    zb = jnp.zeros((rb, H), jnp.float32)
    cols = []
    for k in range(4):
        sl = slice(k * H, (k + 1) * H)
        cols.append(jnp.concatenate([mat_f[:, sl], zb], axis=0))   # fwd half of gate k
        cols.append(jnp.concatenate([zf, mat_b[:, sl]], axis=0))   # bwd half of gate k
    return jnp.concatenate(cols, axis=1)


def _interleave_gate_bias(b_f, b_b, hidden):
    H = hidden
    parts = []
    for k in range(4):
        parts.append(b_f[k * H:(k + 1) * H])
        parts.append(b_b[k * H:(k + 1) * H])
    return jnp.concatenate(parts).reshape(1, 8 * H)


def _full_spec(shape):
    return pl.BlockSpec(shape, lambda: (0,) * len(shape))


# ---------------------------------------------------------------------------
# Forward wrapper (num_layers = 2, eval mode)
# ---------------------------------------------------------------------------

def lstm_model_forward(x_btd, params):
    """Equivalent of LSTMModel.forward (eval mode). x_btd: (B, T, D_in) batch_first."""
    B, T, Din = x_btd.shape
    H = params["w_hh_l0"].shape[1]
    O = params["fc_w"].shape[0]

    # batch_first -> time-major, augmented with the time-reversed copy so both
    # directions' hoisted projections share one matmul (free wrapper-side layout op).
    x_t = jnp.transpose(x_btd, (1, 0, 2)).astype(jnp.float32)            # (T, B, Din)
    x_aug = jnp.concatenate([x_t, x_t[::-1]], axis=-1).reshape(T * B, 2 * Din)

    # Layer-0 combined-direction weights (gate-interleaved, block-diagonal).
    wx0 = _interleave_gate_cols(params["w_ih_l0"].T, params["w_ih_l0_rev"].T, H)
    wh0 = _interleave_gate_cols(params["w_hh_l0"].T, params["w_hh_l0_rev"].T, H)
    b0 = _interleave_gate_bias(params["b_l0"], params["b_l0_rev"], H)

    # Layer-1 (final) weights, PyTorch layout transposed for right-multiplication.
    wih1f = params["w_ih_l1"].T                                          # (2H, 4H)
    whh1f = params["w_hh_l1"].T                                          # (H, 4H)
    b1f = params["b_l1"].reshape(1, 4 * H)
    wih1b = params["w_ih_l1_rev"].T                                      # (2H, 4H)
    b1b = params["b_l1_rev"].reshape(1, 4 * H)
    fcw = params["fc_w"].T                                               # (2H, O)
    fcb = params["fc_b"].reshape(1, O)

    kernel = functools.partial(_lstm_model_kernel, seq=T, batch=B, hidden=H)
    in_arrays = (x_aug, wx0, wh0, b0, wih1f, whh1f, b1f, wih1b, b1b, fcw, fcb)
    return pl.pallas_call(
        kernel,
        out_shape=jax.ShapeDtypeStruct((B, O), jnp.float32),
        in_specs=[_full_spec(a.shape) for a in in_arrays],
        out_specs=_full_spec((B, O)),
    )(*in_arrays)


# ---------------------------------------------------------------------------
# Deterministic parameter init (PyTorch-style uniform(-1/sqrt(H), 1/sqrt(H)))
# ---------------------------------------------------------------------------

def init_params(key, input_size, hidden_size, output_size, num_layers=2):
    params = {}
    bound = 1.0 / jnp.sqrt(hidden_size)
    for layer in range(num_layers):
        d_in = input_size if layer == 0 else 2 * hidden_size
        for suffix in ("", "_rev"):
            key, k1, k2, k3, k4 = jax.random.split(key, 5)
            params[f"w_ih_l{layer}{suffix}"] = jax.random.uniform(
                k1, (4 * hidden_size, d_in), jnp.float32, -bound, bound)
            params[f"w_hh_l{layer}{suffix}"] = jax.random.uniform(
                k2, (4 * hidden_size, hidden_size), jnp.float32, -bound, bound)
            b_ih = jax.random.uniform(k3, (4 * hidden_size,), jnp.float32, -bound, bound)
            b_hh = jax.random.uniform(k4, (4 * hidden_size,), jnp.float32, -bound, bound)
            params[f"b_l{layer}{suffix}"] = b_ih + b_hh
    key, k1, k2 = jax.random.split(key, 3)
    fc_bound = 1.0 / jnp.sqrt(2 * hidden_size)
    params["fc_w"] = jax.random.uniform(
        k1, (output_size, 2 * hidden_size), jnp.float32, -fc_bound, fc_bound)
    params["fc_b"] = jax.random.uniform(
        k2, (output_size,), jnp.float32, -fc_bound, fc_bound)
    return params


# ---------------------------------------------------------------------------
# Pure-JAX reference (for correctness check)
# ---------------------------------------------------------------------------

def _ref_direction(x_tbd, w_ih, w_hh, b, reverse):
    T, B, _ = x_tbd.shape
    H = w_hh.shape[1]
    xs = x_tbd[::-1] if reverse else x_tbd

    def step(carry, x_t):
        h, c = carry
        gates = x_t @ w_ih.T + h @ w_hh.T + b
        i = jax.nn.sigmoid(gates[:, 0 * H:1 * H])
        f = jax.nn.sigmoid(gates[:, 1 * H:2 * H])
        g = jnp.tanh(gates[:, 2 * H:3 * H])
        o = jax.nn.sigmoid(gates[:, 3 * H:4 * H])
        c_new = f * c + i * g
        h_new = o * jnp.tanh(c_new)
        return (h_new, c_new), h_new

    init = (jnp.zeros((B, H), jnp.float32), jnp.zeros((B, H), jnp.float32))
    _, hs = jax.lax.scan(step, init, xs)
    return hs[::-1] if reverse else hs


def ref_forward(x_btd, params, num_layers=2):
    h = jnp.transpose(x_btd, (1, 0, 2)).astype(jnp.float32)
    for layer in range(num_layers):
        fwd = _ref_direction(h, params[f"w_ih_l{layer}"], params[f"w_hh_l{layer}"],
                             params[f"b_l{layer}"], False)
        bwd = _ref_direction(h, params[f"w_ih_l{layer}_rev"], params[f"w_hh_l{layer}_rev"],
                             params[f"b_l{layer}_rev"], True)
        h = jnp.concatenate([fwd, bwd], axis=-1)
    last = h[-1]
    return last @ params["fc_w"].T + params["fc_b"]


# ---------------------------------------------------------------------------
# Main
# ---------------------------------------------------------------------------

if __name__ == "__main__":
    # Small shapes consistent with the module: batch=2, seq=8, input=32, hidden=32, output=2.
    batch, seq, input_size, hidden_size, output_size = 2, 8, 32, 32, 2

    key = jax.random.PRNGKey(0)
    key, kx, kp = jax.random.split(key, 3)
    x = jax.random.normal(kx, (batch, seq, input_size), jnp.float32)
    params = init_params(kp, input_size, hidden_size, output_size)

    out = lstm_model_forward(x, params)
    out = jax.block_until_ready(out)

    ref = jax.block_until_ready(ref_forward(x, params))
    assert out.shape == (batch, output_size)
    assert jnp.allclose(out, ref, atol=1e-5, rtol=1e-5), (out, ref)

    print("KERNEL_OK")
</pallas_src>

<mosaic_0001>
module attributes {stable_mosaic.version = 11 : i64} {
  func.func @_lstm_model_kernel(%arg0: memref<16x64xf32, #tpu.memory_space<vmem>>, %arg1: memref<64x256xf32, #tpu.memory_space<vmem>>, %arg2: memref<64x256xf32, #tpu.memory_space<vmem>>, %arg3: memref<1x256xf32, #tpu.memory_space<vmem>>, %arg4: memref<64x128xf32, #tpu.memory_space<vmem>>, %arg5: memref<32x128xf32, #tpu.memory_space<vmem>>, %arg6: memref<1x128xf32, #tpu.memory_space<vmem>>, %arg7: memref<64x128xf32, #tpu.memory_space<vmem>>, %arg8: memref<1x128xf32, #tpu.memory_space<vmem>>, %arg9: memref<64x2xf32, #tpu.memory_space<vmem>>, %arg10: memref<1x2xf32, #tpu.memory_space<vmem>>, %arg11: memref<2x2xf32, #tpu.memory_space<vmem>>) attributes {dimension_semantics = [], scalar_prefetch = 0 : i64, scratch_operands = 0 : i64, tpu.core_type = #tpu.core_type<tc>} {
    %c0 = arith.constant 0 : index
    %c0_0 = arith.constant 0 : index
    %0 = vector.load %arg0[%c0, %c0_0] : memref<16x64xf32, #tpu.memory_space<vmem>>, vector<16x64xf32>
    %c0_1 = arith.constant 0 : index
    %c0_2 = arith.constant 0 : index
    %1 = vector.load %arg1[%c0_1, %c0_2] : memref<64x256xf32, #tpu.memory_space<vmem>>, vector<64x256xf32>
    %cst = arith.constant dense<0.000000e+00> : vector<16x256xf32>
    %2 = tpu.matmul %0, %1, %cst {dimension_numbers = #tpu.dot_dimension_numbers<[1], [0], [0], [1], [0, 0, 1, 1], [], []>} : vector<16x64xf32>, vector<64x256xf32>, vector<16x256xf32> -> vector<16x256xf32>
    %c0_3 = arith.constant 0 : index
    %c0_4 = arith.constant 0 : index
    %3 = vector.load %arg3[%c0_3, %c0_4] : memref<1x256xf32, #tpu.memory_space<vmem>>, vector<1x256xf32>
    %4 = vector.broadcast %3 : vector<1x256xf32> to vector<16x256xf32>
    %5 = arith.addf %2, %4 : vector<16x256xf32>
    %cst_5 = arith.constant 0.000000e+00 : f32
    %6 = vector.broadcast %cst_5 : f32 to vector<2x64xf32>
    %cst_6 = arith.constant 0.000000e+00 : f32
    %7 = vector.broadcast %cst_6 : f32 to vector<2x64xf32>
    %8 = vector.extract_strided_slice %5 {offsets = [0, 0], sizes = [2, 256], strides = [1, 1]} : vector<16x256xf32> to vector<2x256xf32>
    %c0_7 = arith.constant 0 : index
    %c0_8 = arith.constant 0 : index
    %9 = vector.load %arg2[%c0_7, %c0_8] : memref<64x256xf32, #tpu.memory_space<vmem>>, vector<64x256xf32>
    %cst_9 = arith.constant dense<0.000000e+00> : vector<2x256xf32>
    %10 = tpu.matmul %6, %9, %cst_9 {dimension_numbers = #tpu.dot_dimension_numbers<[1], [0], [0], [1], [0, 0, 1, 1], [], []>} : vector<2x64xf32>, vector<64x256xf32>, vector<2x256xf32> -> vector<2x256xf32>
    %11 = arith.addf %8, %10 : vector<2x256xf32>
    %12 = vector.extract_strided_slice %11 {offsets = [0, 0], sizes = [2, 64], strides = [1, 1]} : vector<2x256xf32> to vector<2x64xf32>
    %13 = arith.negf %12 : vector<2x64xf32>
    %14 = math.exp %13 : vector<2x64xf32>
    %cst_10 = arith.constant 1.000000e+00 : f32
    %15 = vector.broadcast %cst_10 : f32 to vector<2x64xf32>
    %16 = arith.addf %15, %14 : vector<2x64xf32>
    %17 = arith.divf %15, %16 : vector<2x64xf32>
    %18 = vector.extract_strided_slice %11 {offsets = [0, 64], sizes = [2, 64], strides = [1, 1]} : vector<2x256xf32> to vector<2x64xf32>
    %19 = arith.negf %18 : vector<2x64xf32>
    %20 = math.exp %19 : vector<2x64xf32>
    %cst_11 = arith.constant 1.000000e+00 : f32
    %21 = vector.broadcast %cst_11 : f32 to vector<2x64xf32>
    %22 = arith.addf %21, %20 : vector<2x64xf32>
    %23 = arith.divf %21, %22 : vector<2x64xf32>
    %24 = vector.extract_strided_slice %11 {offsets = [0, 128], sizes = [2, 64], strides = [1, 1]} : vector<2x256xf32> to vector<2x64xf32>
    %25 = math.tanh %24 : vector<2x64xf32>
    %26 = vector.extract_strided_slice %11 {offsets = [0, 192], sizes = [2, 64], strides = [1, 1]} : vector<2x256xf32> to vector<2x64xf32>
    %27 = arith.negf %26 : vector<2x64xf32>
    %28 = math.exp %27 : vector<2x64xf32>
    %cst_12 = arith.constant 1.000000e+00 : f32
    %29 = vector.broadcast %cst_12 : f32 to vector<2x64xf32>
    %30 = arith.addf %29, %28 : vector<2x64xf32>
    %31 = arith.divf %29, %30 : vector<2x64xf32>
    %32 = arith.mulf %23, %7 : vector<2x64xf32>
    %33 = arith.mulf %17, %25 : vector<2x64xf32>
    %34 = arith.addf %32, %33 : vector<2x64xf32>
    %35 = math.tanh %34 : vector<2x64xf32>
    %36 = arith.mulf %31, %35 : vector<2x64xf32>
    %37 = vector.extract_strided_slice %5 {offsets = [2, 0], sizes = [2, 256], strides = [1, 1]} : vector<16x256xf32> to vector<2x256xf32>
    %c0_13 = arith.constant 0 : index
    %c0_14 = arith.constant 0 : index
    %38 = vector.load %arg2[%c0_13, %c0_14] : memref<64x256xf32, #tpu.memory_space<vmem>>, vector<64x256xf32>
    %cst_15 = arith.constant dense<0.000000e+00> : vector<2x256xf32>
    %39 = tpu.matmul %36, %38, %cst_15 {dimension_numbers = #tpu.dot_dimension_numbers<[1], [0], [0], [1], [0, 0, 1, 1], [], []>} : vector<2x64xf32>, vector<64x256xf32>, vector<2x256xf32> -> vector<2x256xf32>
    %40 = arith.addf %37, %39 : vector<2x256xf32>
    %41 = vector.extract_strided_slice %40 {offsets = [0, 0], sizes = [2, 64], strides = [1, 1]} : vector<2x256xf32> to vector<2x64xf32>
    %42 = arith.negf %41 : vector<2x64xf32>
    %43 = math.exp %42 : vector<2x64xf32>
    %cst_16 = arith.constant 1.000000e+00 : f32
    %44 = vector.broadcast %cst_16 : f32 to vector<2x64xf32>
    %45 = arith.addf %44, %43 : vector<2x64xf32>
    %46 = arith.divf %44, %45 : vector<2x64xf32>
    %47 = vector.extract_strided_slice %40 {offsets = [0, 64], sizes = [2, 64], strides = [1, 1]} : vector<2x256xf32> to vector<2x64xf32>
    %48 = arith.negf %47 : vector<2x64xf32>
    %49 = math.exp %48 : vector<2x64xf32>
    %cst_17 = arith.constant 1.000000e+00 : f32
    %50 = vector.broadcast %cst_17 : f32 to vector<2x64xf32>
    %51 = arith.addf %50, %49 : vector<2x64xf32>
    %52 = arith.divf %50, %51 : vector<2x64xf32>
    %53 = vector.extract_strided_slice %40 {offsets = [0, 128], sizes = [2, 64], strides = [1, 1]} : vector<2x256xf32> to vector<2x64xf32>
    %54 = math.tanh %53 : vector<2x64xf32>
    %55 = vector.extract_strided_slice %40 {offsets = [0, 192], sizes = [2, 64], strides = [1, 1]} : vector<2x256xf32> to vector<2x64xf32>
    %56 = arith.negf %55 : vector<2x64xf32>
    %57 = math.exp %56 : vector<2x64xf32>
    %cst_18 = arith.constant 1.000000e+00 : f32
    %58 = vector.broadcast %cst_18 : f32 to vector<2x64xf32>
    %59 = arith.addf %58, %57 : vector<2x64xf32>
    %60 = arith.divf %58, %59 : vector<2x64xf32>
    %61 = arith.mulf %52, %34 : vector<2x64xf32>
    %62 = arith.mulf %46, %54 : vector<2x64xf32>
    %63 = arith.addf %61, %62 : vector<2x64xf32>
    %64 = math.tanh %63 : vector<2x64xf32>
    %65 = arith.mulf %60, %64 : vector<2x64xf32>
    %66 = vector.extract_strided_slice %5 {offsets = [4, 0], sizes = [2, 256], strides = [1, 1]} : vector<16x256xf32> to vector<2x256xf32>
    %c0_19 = arith.constant 0 : index
    %c0_20 = arith.constant 0 : index
    %67 = vector.load %arg2[%c0_19, %c0_20] : memref<64x256xf32, #tpu.memory_space<vmem>>, vector<64x256xf32>
    %cst_21 = arith.constant dense<0.000000e+00> : vector<2x256xf32>
    %68 = tpu.matmul %65, %67, %cst_21 {dimension_numbers = #tpu.dot_dimension_numbers<[1], [0], [0], [1], [0, 0, 1, 1], [], []>} : vector<2x64xf32>, vector<64x256xf32>, vector<2x256xf32> -> vector<2x256xf32>
    %69 = arith.addf %66, %68 : vector<2x256xf32>
    %70 = vector.extract_strided_slice %69 {offsets = [0, 0], sizes = [2, 64], strides = [1, 1]} : vector<2x256xf32> to vector<2x64xf32>
    %71 = arith.negf %70 : vector<2x64xf32>
    %72 = math.exp %71 : vector<2x64xf32>
    %cst_22 = arith.constant 1.000000e+00 : f32
    %73 = vector.broadcast %cst_22 : f32 to vector<2x64xf32>
    %74 = arith.addf %73, %72 : vector<2x64xf32>
    %75 = arith.divf %73, %74 : vector<2x64xf32>
    %76 = vector.extract_strided_slice %69 {offsets = [0, 64], sizes = [2, 64], strides = [1, 1]} : vector<2x256xf32> to vector<2x64xf32>
    %77 = arith.negf %76 : vector<2x64xf32>
    %78 = math.exp %77 : vector<2x64xf32>
    %cst_23 = arith.constant 1.000000e+00 : f32
    %79 = vector.broadcast %cst_23 : f32 to vector<2x64xf32>
    %80 = arith.addf %79, %78 : vector<2x64xf32>
    %81 = arith.divf %79, %80 : vector<2x64xf32>
    %82 = vector.extract_strided_slice %69 {offsets = [0, 128], sizes = [2, 64], strides = [1, 1]} : vector<2x256xf32> to vector<2x64xf32>
    %83 = math.tanh %82 : vector<2x64xf32>
    %84 = vector.extract_strided_slice %69 {offsets = [0, 192], sizes = [2, 64], strides = [1, 1]} : vector<2x256xf32> to vector<2x64xf32>
    %85 = arith.negf %84 : vector<2x64xf32>
    %86 = math.exp %85 : vector<2x64xf32>
    %cst_24 = arith.constant 1.000000e+00 : f32
    %87 = vector.broadcast %cst_24 : f32 to vector<2x64xf32>
    %88 = arith.addf %87, %86 : vector<2x64xf32>
    %89 = arith.divf %87, %88 : vector<2x64xf32>
    %90 = arith.mulf %81, %63 : vector<2x64xf32>
    %91 = arith.mulf %75, %83 : vector<2x64xf32>
    %92 = arith.addf %90, %91 : vector<2x64xf32>
    %93 = math.tanh %92 : vector<2x64xf32>
    %94 = arith.mulf %89, %93 : vector<2x64xf32>
    %95 = vector.extract_strided_slice %5 {offsets = [6, 0], sizes = [2, 256], strides = [1, 1]} : vector<16x256xf32> to vector<2x256xf32>
    %c0_25 = arith.constant 0 : index
    %c0_26 = arith.constant 0 : index
    %96 = vector.load %arg2[%c0_25, %c0_26] : memref<64x256xf32, #tpu.memory_space<vmem>>, vector<64x256xf32>
    %cst_27 = arith.constant dense<0.000000e+00> : vector<2x256xf32>
    %97 = tpu.matmul %94, %96, %cst_27 {dimension_numbers = #tpu.dot_dimension_numbers<[1], [0], [0], [1], [0, 0, 1, 1], [], []>} : vector<2x64xf32>, vector<64x256xf32>, vector<2x256xf32> -> vector<2x256xf32>
    %98 = arith.addf %95, %97 : vector<2x256xf32>
    %99 = vector.extract_strided_slice %98 {offsets = [0, 0], sizes = [2, 64], strides = [1, 1]} : vector<2x256xf32> to vector<2x64xf32>
    %100 = arith.negf %99 : vector<2x64xf32>
    %101 = math.exp %100 : vector<2x64xf32>
    %cst_28 = arith.constant 1.000000e+00 : f32
    %102 = vector.broadcast %cst_28 : f32 to vector<2x64xf32>
    %103 = arith.addf %102, %101 : vector<2x64xf32>
    %104 = arith.divf %102, %103 : vector<2x64xf32>
    %105 = vector.extract_strided_slice %98 {offsets = [0, 64], sizes = [2, 64], strides = [1, 1]} : vector<2x256xf32> to vector<2x64xf32>
    %106 = arith.negf %105 : vector<2x64xf32>
    %107 = math.exp %106 : vector<2x64xf32>
    %cst_29 = arith.constant 1.000000e+00 : f32
    %108 = vector.broadcast %cst_29 : f32 to vector<2x64xf32>
    %109 = arith.addf %108, %107 : vector<2x64xf32>
    %110 = arith.divf %108, %109 : vector<2x64xf32>
    %111 = vector.extract_strided_slice %98 {offsets = [0, 128], sizes = [2, 64], strides = [1, 1]} : vector<2x256xf32> to vector<2x64xf32>
    %112 = math.tanh %111 : vector<2x64xf32>
    %113 = vector.extract_strided_slice %98 {offsets = [0, 192], sizes = [2, 64], strides = [1, 1]} : vector<2x256xf32> to vector<2x64xf32>
    %114 = arith.negf %113 : vector<2x64xf32>
    %115 = math.exp %114 : vector<2x64xf32>
    %cst_30 = arith.constant 1.000000e+00 : f32
    %116 = vector.broadcast %cst_30 : f32 to vector<2x64xf32>
    %117 = arith.addf %116, %115 : vector<2x64xf32>
    %118 = arith.divf %116, %117 : vector<2x64xf32>
    %119 = arith.mulf %110, %92 : vector<2x64xf32>
    %120 = arith.mulf %104, %112 : vector<2x64xf32>
    %121 = arith.addf %119, %120 : vector<2x64xf32>
    %122 = math.tanh %121 : vector<2x64xf32>
    %123 = arith.mulf %118, %122 : vector<2x64xf32>
    %124 = vector.extract_strided_slice %5 {offsets = [8, 0], sizes = [2, 256], strides = [1, 1]} : vector<16x256xf32> to vector<2x256xf32>
    %c0_31 = arith.constant 0 : index
    %c0_32 = arith.constant 0 : index
    %125 = vector.load %arg2[%c0_31, %c0_32] : memref<64x256xf32, #tpu.memory_space<vmem>>, vector<64x256xf32>
    %cst_33 = arith.constant dense<0.000000e+00> : vector<2x256xf32>
    %126 = tpu.matmul %123, %125, %cst_33 {dimension_numbers = #tpu.dot_dimension_numbers<[1], [0], [0], [1], [0, 0, 1, 1], [], []>} : vector<2x64xf32>, vector<64x256xf32>, vector<2x256xf32> -> vector<2x256xf32>
    %127 = arith.addf %124, %126 : vector<2x256xf32>
    %128 = vector.extract_strided_slice %127 {offsets = [0, 0], sizes = [2, 64], strides = [1, 1]} : vector<2x256xf32> to vector<2x64xf32>
    %129 = arith.negf %128 : vector<2x64xf32>
    %130 = math.exp %129 : vector<2x64xf32>
    %cst_34 = arith.constant 1.000000e+00 : f32
    %131 = vector.broadcast %cst_34 : f32 to vector<2x64xf32>
    %132 = arith.addf %131, %130 : vector<2x64xf32>
    %133 = arith.divf %131, %132 : vector<2x64xf32>
    %134 = vector.extract_strided_slice %127 {offsets = [0, 64], sizes = [2, 64], strides = [1, 1]} : vector<2x256xf32> to vector<2x64xf32>
    %135 = arith.negf %134 : vector<2x64xf32>
    %136 = math.exp %135 : vector<2x64xf32>
    %cst_35 = arith.constant 1.000000e+00 : f32
    %137 = vector.broadcast %cst_35 : f32 to vector<2x64xf32>
    %138 = arith.addf %137, %136 : vector<2x64xf32>
    %139 = arith.divf %137, %138 : vector<2x64xf32>
    %140 = vector.extract_strided_slice %127 {offsets = [0, 128], sizes = [2, 64], strides = [1, 1]} : vector<2x256xf32> to vector<2x64xf32>
    %141 = math.tanh %140 : vector<2x64xf32>
    %142 = vector.extract_strided_slice %127 {offsets = [0, 192], sizes = [2, 64], strides = [1, 1]} : vector<2x256xf32> to vector<2x64xf32>
    %143 = arith.negf %142 : vector<2x64xf32>
    %144 = math.exp %143 : vector<2x64xf32>
    %cst_36 = arith.constant 1.000000e+00 : f32
    %145 = vector.broadcast %cst_36 : f32 to vector<2x64xf32>
    %146 = arith.addf %145, %144 : vector<2x64xf32>
    %147 = arith.divf %145, %146 : vector<2x64xf32>
    %148 = arith.mulf %139, %121 : vector<2x64xf32>
    %149 = arith.mulf %133, %141 : vector<2x64xf32>
    %150 = arith.addf %148, %149 : vector<2x64xf32>
    %151 = math.tanh %150 : vector<2x64xf32>
    %152 = arith.mulf %147, %151 : vector<2x64xf32>
    %153 = vector.extract_strided_slice %5 {offsets = [10, 0], sizes = [2, 256], strides = [1, 1]} : vector<16x256xf32> to vector<2x256xf32>
    %c0_37 = arith.constant 0 : index
    %c0_38 = arith.constant 0 : index
    %154 = vector.load %arg2[%c0_37, %c0_38] : memref<64x256xf32, #tpu.memory_space<vmem>>, vector<64x256xf32>
    %cst_39 = arith.constant dense<0.000000e+00> : vector<2x256xf32>
    %155 = tpu.matmul %152, %154, %cst_39 {dimension_numbers = #tpu.dot_dimension_numbers<[1], [0], [0], [1], [0, 0, 1, 1], [], []>} : vector<2x64xf32>, vector<64x256xf32>, vector<2x256xf32> -> vector<2x256xf32>
    %156 = arith.addf %153, %155 : vector<2x256xf32>
    %157 = vector.extract_strided_slice %156 {offsets = [0, 0], sizes = [2, 64], strides = [1, 1]} : vector<2x256xf32> to vector<2x64xf32>
    %158 = arith.negf %157 : vector<2x64xf32>
    %159 = math.exp %158 : vector<2x64xf32>
    %cst_40 = arith.constant 1.000000e+00 : f32
    %160 = vector.broadcast %cst_40 : f32 to vector<2x64xf32>
    %161 = arith.addf %160, %159 : vector<2x64xf32>
    %162 = arith.divf %160, %161 : vector<2x64xf32>
    %163 = vector.extract_strided_slice %156 {offsets = [0, 64], sizes = [2, 64], strides = [1, 1]} : vector<2x256xf32> to vector<2x64xf32>
    %164 = arith.negf %163 : vector<2x64xf32>
    %165 = math.exp %164 : vector<2x64xf32>
    %cst_41 = arith.constant 1.000000e+00 : f32
    %166 = vector.broadcast %cst_41 : f32 to vector<2x64xf32>
    %167 = arith.addf %166, %165 : vector<2x64xf32>
    %168 = arith.divf %166, %167 : vector<2x64xf32>
    %169 = vector.extract_strided_slice %156 {offsets = [0, 128], sizes = [2, 64], strides = [1, 1]} : vector<2x256xf32> to vector<2x64xf32>
    %170 = math.tanh %169 : vector<2x64xf32>
    %171 = vector.extract_strided_slice %156 {offsets = [0, 192], sizes = [2, 64], strides = [1, 1]} : vector<2x256xf32> to vector<2x64xf32>
    %172 = arith.negf %171 : vector<2x64xf32>
    %173 = math.exp %172 : vector<2x64xf32>
    %cst_42 = arith.constant 1.000000e+00 : f32
    %174 = vector.broadcast %cst_42 : f32 to vector<2x64xf32>
    %175 = arith.addf %174, %173 : vector<2x64xf32>
    %176 = arith.divf %174, %175 : vector<2x64xf32>
    %177 = arith.mulf %168, %150 : vector<2x64xf32>
    %178 = arith.mulf %162, %170 : vector<2x64xf32>
    %179 = arith.addf %177, %178 : vector<2x64xf32>
    %180 = math.tanh %179 : vector<2x64xf32>
    %181 = arith.mulf %176, %180 : vector<2x64xf32>
    %182 = vector.extract_strided_slice %5 {offsets = [12, 0], sizes = [2, 256], strides = [1, 1]} : vector<16x256xf32> to vector<2x256xf32>
    %c0_43 = arith.constant 0 : index
    %c0_44 = arith.constant 0 : index
    %183 = vector.load %arg2[%c0_43, %c0_44] : memref<64x256xf32, #tpu.memory_space<vmem>>, vector<64x256xf32>
    %cst_45 = arith.constant dense<0.000000e+00> : vector<2x256xf32>
    %184 = tpu.matmul %181, %183, %cst_45 {dimension_numbers = #tpu.dot_dimension_numbers<[1], [0], [0], [1], [0, 0, 1, 1], [], []>} : vector<2x64xf32>, vector<64x256xf32>, vector<2x256xf32> -> vector<2x256xf32>
    %185 = arith.addf %182, %184 : vector<2x256xf32>
    %186 = vector.extract_strided_slice %185 {offsets = [0, 0], sizes = [2, 64], strides = [1, 1]} : vector<2x256xf32> to vector<2x64xf32>
    %187 = arith.negf %186 : vector<2x64xf32>
    %188 = math.exp %187 : vector<2x64xf32>
    %cst_46 = arith.constant 1.000000e+00 : f32
    %189 = vector.broadcast %cst_46 : f32 to vector<2x64xf32>
    %190 = arith.addf %189, %188 : vector<2x64xf32>
    %191 = arith.divf %189, %190 : vector<2x64xf32>
    %192 = vector.extract_strided_slice %185 {offsets = [0, 64], sizes = [2, 64], strides = [1, 1]} : vector<2x256xf32> to vector<2x64xf32>
    %193 = arith.negf %192 : vector<2x64xf32>
    %194 = math.exp %193 : vector<2x64xf32>
    %cst_47 = arith.constant 1.000000e+00 : f32
    %195 = vector.broadcast %cst_47 : f32 to vector<2x64xf32>
    %196 = arith.addf %195, %194 : vector<2x64xf32>
    %197 = arith.divf %195, %196 : vector<2x64xf32>
    %198 = vector.extract_strided_slice %185 {offsets = [0, 128], sizes = [2, 64], strides = [1, 1]} : vector<2x256xf32> to vector<2x64xf32>
    %199 = math.tanh %198 : vector<2x64xf32>
    %200 = vector.extract_strided_slice %185 {offsets = [0, 192], sizes = [2, 64], strides = [1, 1]} : vector<2x256xf32> to vector<2x64xf32>
    %201 = arith.negf %200 : vector<2x64xf32>
    %202 = math.exp %201 : vector<2x64xf32>
    %cst_48 = arith.constant 1.000000e+00 : f32
    %203 = vector.broadcast %cst_48 : f32 to vector<2x64xf32>
    %204 = arith.addf %203, %202 : vector<2x64xf32>
    %205 = arith.divf %203, %204 : vector<2x64xf32>
    %206 = arith.mulf %197, %179 : vector<2x64xf32>
    %207 = arith.mulf %191, %199 : vector<2x64xf32>
    %208 = arith.addf %206, %207 : vector<2x64xf32>
    %209 = math.tanh %208 : vector<2x64xf32>
    %210 = arith.mulf %205, %209 : vector<2x64xf32>
    %211 = vector.extract_strided_slice %5 {offsets = [14, 0], sizes = [2, 256], strides = [1, 1]} : vector<16x256xf32> to vector<2x256xf32>
    %c0_49 = arith.constant 0 : index
    %c0_50 = arith.constant 0 : index
    %212 = vector.load %arg2[%c0_49, %c0_50] : memref<64x256xf32, #tpu.memory_space<vmem>>, vector<64x256xf32>
    %cst_51 = arith.constant dense<0.000000e+00> : vector<2x256xf32>
    %213 = tpu.matmul %210, %212, %cst_51 {dimension_numbers = #tpu.dot_dimension_numbers<[1], [0], [0], [1], [0, 0, 1, 1], [], []>} : vector<2x64xf32>, vector<64x256xf32>, vector<2x256xf32> -> vector<2x256xf32>
    %214 = arith.addf %211, %213 : vector<2x256xf32>
    %215 = vector.extract_strided_slice %214 {offsets = [0, 0], sizes = [2, 64], strides = [1, 1]} : vector<2x256xf32> to vector<2x64xf32>
    %216 = arith.negf %215 : vector<2x64xf32>
    %217 = math.exp %216 : vector<2x64xf32>
    %cst_52 = arith.constant 1.000000e+00 : f32
    %218 = vector.broadcast %cst_52 : f32 to vector<2x64xf32>
    %219 = arith.addf %218, %217 : vector<2x64xf32>
    %220 = arith.divf %218, %219 : vector<2x64xf32>
    %221 = vector.extract_strided_slice %214 {offsets = [0, 64], sizes = [2, 64], strides = [1, 1]} : vector<2x256xf32> to vector<2x64xf32>
    %222 = arith.negf %221 : vector<2x64xf32>
    %223 = math.exp %222 : vector<2x64xf32>
    %cst_53 = arith.constant 1.000000e+00 : f32
    %224 = vector.broadcast %cst_53 : f32 to vector<2x64xf32>
    %225 = arith.addf %224, %223 : vector<2x64xf32>
    %226 = arith.divf %224, %225 : vector<2x64xf32>
    %227 = vector.extract_strided_slice %214 {offsets = [0, 128], sizes = [2, 64], strides = [1, 1]} : vector<2x256xf32> to vector<2x64xf32>
    %228 = math.tanh %227 : vector<2x64xf32>
    %229 = vector.extract_strided_slice %214 {offsets = [0, 192], sizes = [2, 64], strides = [1, 1]} : vector<2x256xf32> to vector<2x64xf32>
    %230 = arith.negf %229 : vector<2x64xf32>
    %231 = math.exp %230 : vector<2x64xf32>
    %cst_54 = arith.constant 1.000000e+00 : f32
    %232 = vector.broadcast %cst_54 : f32 to vector<2x64xf32>
    %233 = arith.addf %232, %231 : vector<2x64xf32>
    %234 = arith.divf %232, %233 : vector<2x64xf32>
    %235 = arith.mulf %226, %208 : vector<2x64xf32>
    %236 = arith.mulf %220, %228 : vector<2x64xf32>
    %237 = arith.addf %235, %236 : vector<2x64xf32>
    %238 = math.tanh %237 : vector<2x64xf32>
    %239 = arith.mulf %234, %238 : vector<2x64xf32>
    %240 = vector.extract_strided_slice %36 {offsets = [0, 0], sizes = [2, 32], strides = [1, 1]} : vector<2x64xf32> to vector<2x32xf32>
    %241 = vector.extract_strided_slice %239 {offsets = [0, 32], sizes = [2, 32], strides = [1, 1]} : vector<2x64xf32> to vector<2x32xf32>
    %242 = tpu.concatenate %240, %241 in 1 : vector<2x32xf32>, vector<2x32xf32> -> vector<2x64xf32>
    %243 = vector.extract_strided_slice %65 {offsets = [0, 0], sizes = [2, 32], strides = [1, 1]} : vector<2x64xf32> to vector<2x32xf32>
    %244 = vector.extract_strided_slice %210 {offsets = [0, 32], sizes = [2, 32], strides = [1, 1]} : vector<2x64xf32> to vector<2x32xf32>
    %245 = tpu.concatenate %243, %244 in 1 : vector<2x32xf32>, vector<2x32xf32> -> vector<2x64xf32>
    %246 = vector.extract_strided_slice %94 {offsets = [0, 0], sizes = [2, 32], strides = [1, 1]} : vector<2x64xf32> to vector<2x32xf32>
    %247 = vector.extract_strided_slice %181 {offsets = [0, 32], sizes = [2, 32], strides = [1, 1]} : vector<2x64xf32> to vector<2x32xf32>
    %248 = tpu.concatenate %246, %247 in 1 : vector<2x32xf32>, vector<2x32xf32> -> vector<2x64xf32>
    %249 = vector.extract_strided_slice %123 {offsets = [0, 0], sizes = [2, 32], strides = [1, 1]} : vector<2x64xf32> to vector<2x32xf32>
    %250 = vector.extract_strided_slice %152 {offsets = [0, 32], sizes = [2, 32], strides = [1, 1]} : vector<2x64xf32> to vector<2x32xf32>
    %251 = tpu.concatenate %249, %250 in 1 : vector<2x32xf32>, vector<2x32xf32> -> vector<2x64xf32>
    %252 = vector.extract_strided_slice %152 {offsets = [0, 0], sizes = [2, 32], strides = [1, 1]} : vector<2x64xf32> to vector<2x32xf32>
    %253 = vector.extract_strided_slice %123 {offsets = [0, 32], sizes = [2, 32], strides = [1, 1]} : vector<2x64xf32> to vector<2x32xf32>
    %254 = tpu.concatenate %252, %253 in 1 : vector<2x32xf32>, vector<2x32xf32> -> vector<2x64xf32>
    %255 = vector.extract_strided_slice %181 {offsets = [0, 0], sizes = [2, 32], strides = [1, 1]} : vector<2x64xf32> to vector<2x32xf32>
    %256 = vector.extract_strided_slice %94 {offsets = [0, 32], sizes = [2, 32], strides = [1, 1]} : vector<2x64xf32> to vector<2x32xf32>
    %257 = tpu.concatenate %255, %256 in 1 : vector<2x32xf32>, vector<2x32xf32> -> vector<2x64xf32>
    %258 = vector.extract_strided_slice %210 {offsets = [0, 0], sizes = [2, 32], strides = [1, 1]} : vector<2x64xf32> to vector<2x32xf32>
    %259 = vector.extract_strided_slice %65 {offsets = [0, 32], sizes = [2, 32], strides = [1, 1]} : vector<2x64xf32> to vector<2x32xf32>
    %260 = tpu.concatenate %258, %259 in 1 : vector<2x32xf32>, vector<2x32xf32> -> vector<2x64xf32>
    %261 = vector.extract_strided_slice %239 {offsets = [0, 0], sizes = [2, 32], strides = [1, 1]} : vector<2x64xf32> to vector<2x32xf32>
    %262 = vector.extract_strided_slice %36 {offsets = [0, 32], sizes = [2, 32], strides = [1, 1]} : vector<2x64xf32> to vector<2x32xf32>
    %263 = tpu.concatenate %261, %262 in 1 : vector<2x32xf32>, vector<2x32xf32> -> vector<2x64xf32>
    %264 = tpu.concatenate %242, %245, %248, %251, %254, %257, %260, %263 in 0 : vector<2x64xf32>, vector<2x64xf32>, vector<2x64xf32>, vector<2x64xf32>, vector<2x64xf32>, vector<2x64xf32>, vector<2x64xf32>, vector<2x64xf32> -> vector<16x64xf32>
    %c0_55 = arith.constant 0 : index
    %c0_56 = arith.constant 0 : index
    %265 = vector.load %arg4[%c0_55, %c0_56] : memref<64x128xf32, #tpu.memory_space<vmem>>, vector<64x128xf32>
    %cst_57 = arith.constant dense<0.000000e+00> : vector<16x128xf32>
    %266 = tpu.matmul %264, %265, %cst_57 {dimension_numbers = #tpu.dot_dimension_numbers<[1], [0], [0], [1], [0, 0, 1, 1], [], []>} : vector<16x64xf32>, vector<64x128xf32>, vector<16x128xf32> -> vector<16x128xf32>
    %c0_58 = arith.constant 0 : index
    %c0_59 = arith.constant 0 : index
    %267 = vector.load %arg6[%c0_58, %c0_59] : memref<1x128xf32, #tpu.memory_space<vmem>>, vector<1x128xf32>
    %268 = vector.broadcast %267 : vector<1x128xf32> to vector<16x128xf32>
    %269 = arith.addf %266, %268 : vector<16x128xf32>
    %cst_60 = arith.constant 0.000000e+00 : f32
    %270 = vector.broadcast %cst_60 : f32 to vector<2x32xf32>
    %cst_61 = arith.constant 0.000000e+00 : f32
    %271 = vector.broadcast %cst_61 : f32 to vector<2x32xf32>
    %272 = vector.extract_strided_slice %269 {offsets = [0, 0], sizes = [2, 128], strides = [1, 1]} : vector<16x128xf32> to vector<2x128xf32>
    %c0_62 = arith.constant 0 : index
    %c0_63 = arith.constant 0 : index
    %273 = vector.load %arg5[%c0_62, %c0_63] : memref<32x128xf32, #tpu.memory_space<vmem>>, vector<32x128xf32>
    %cst_64 = arith.constant dense<0.000000e+00> : vector<2x128xf32>
    %274 = tpu.matmul %270, %273, %cst_64 {dimension_numbers = #tpu.dot_dimension_numbers<[1], [0], [0], [1], [0, 0, 1, 1], [], []>} : vector<2x32xf32>, vector<32x128xf32>, vector<2x128xf32> -> vector<2x128xf32>
    %275 = arith.addf %272, %274 : vector<2x128xf32>
    %276 = vector.extract_strided_slice %275 {offsets = [0, 0], sizes = [2, 32], strides = [1, 1]} : vector<2x128xf32> to vector<2x32xf32>
    %277 = arith.negf %276 : vector<2x32xf32>
    %278 = math.exp %277 : vector<2x32xf32>
    %cst_65 = arith.constant 1.000000e+00 : f32
    %279 = vector.broadcast %cst_65 : f32 to vector<2x32xf32>
    %280 = arith.addf %279, %278 : vector<2x32xf32>
    %281 = arith.divf %279, %280 : vector<2x32xf32>
    %282 = vector.extract_strided_slice %275 {offsets = [0, 32], sizes = [2, 32], strides = [1, 1]} : vector<2x128xf32> to vector<2x32xf32>
    %283 = arith.negf %282 : vector<2x32xf32>
    %284 = math.exp %283 : vector<2x32xf32>
    %cst_66 = arith.constant 1.000000e+00 : f32
    %285 = vector.broadcast %cst_66 : f32 to vector<2x32xf32>
    %286 = arith.addf %285, %284 : vector<2x32xf32>
    %287 = arith.divf %285, %286 : vector<2x32xf32>
    %288 = vector.extract_strided_slice %275 {offsets = [0, 64], sizes = [2, 32], strides = [1, 1]} : vector<2x128xf32> to vector<2x32xf32>
    %289 = math.tanh %288 : vector<2x32xf32>
    %290 = vector.extract_strided_slice %275 {offsets = [0, 96], sizes = [2, 32], strides = [1, 1]} : vector<2x128xf32> to vector<2x32xf32>
    %291 = arith.negf %290 : vector<2x32xf32>
    %292 = math.exp %291 : vector<2x32xf32>
    %cst_67 = arith.constant 1.000000e+00 : f32
    %293 = vector.broadcast %cst_67 : f32 to vector<2x32xf32>
    %294 = arith.addf %293, %292 : vector<2x32xf32>
    %295 = arith.divf %293, %294 : vector<2x32xf32>
    %296 = arith.mulf %287, %271 : vector<2x32xf32>
    %297 = arith.mulf %281, %289 : vector<2x32xf32>
    %298 = arith.addf %296, %297 : vector<2x32xf32>
    %299 = math.tanh %298 : vector<2x32xf32>
    %300 = arith.mulf %295, %299 : vector<2x32xf32>
    %301 = vector.extract_strided_slice %269 {offsets = [2, 0], sizes = [2, 128], strides = [1, 1]} : vector<16x128xf32> to vector<2x128xf32>
    %c0_68 = arith.constant 0 : index
    %c0_69 = arith.constant 0 : index
    %302 = vector.load %arg5[%c0_68, %c0_69] : memref<32x128xf32, #tpu.memory_space<vmem>>, vector<32x128xf32>
    %cst_70 = arith.constant dense<0.000000e+00> : vector<2x128xf32>
    %303 = tpu.matmul %300, %302, %cst_70 {dimension_numbers = #tpu.dot_dimension_numbers<[1], [0], [0], [1], [0, 0, 1, 1], [], []>} : vector<2x32xf32>, vector<32x128xf32>, vector<2x128xf32> -> vector<2x128xf32>
    %304 = arith.addf %301, %303 : vector<2x128xf32>
    %305 = vector.extract_strided_slice %304 {offsets = [0, 0], sizes = [2, 32], strides = [1, 1]} : vector<2x128xf32> to vector<2x32xf32>
    %306 = arith.negf %305 : vector<2x32xf32>
    %307 = math.exp %306 : vector<2x32xf32>
    %cst_71 = arith.constant 1.000000e+00 : f32
    %308 = vector.broadcast %cst_71 : f32 to vector<2x32xf32>
    %309 = arith.addf %308, %307 : vector<2x32xf32>
    %310 = arith.divf %308, %309 : vector<2x32xf32>
    %311 = vector.extract_strided_slice %304 {offsets = [0, 32], sizes = [2, 32], strides = [1, 1]} : vector<2x128xf32> to vector<2x32xf32>
    %312 = arith.negf %311 : vector<2x32xf32>
    %313 = math.exp %312 : vector<2x32xf32>
    %cst_72 = arith.constant 1.000000e+00 : f32
    %314 = vector.broadcast %cst_72 : f32 to vector<2x32xf32>
    %315 = arith.addf %314, %313 : vector<2x32xf32>
    %316 = arith.divf %314, %315 : vector<2x32xf32>
    %317 = vector.extract_strided_slice %304 {offsets = [0, 64], sizes = [2, 32], strides = [1, 1]} : vector<2x128xf32> to vector<2x32xf32>
    %318 = math.tanh %317 : vector<2x32xf32>
    %319 = vector.extract_strided_slice %304 {offsets = [0, 96], sizes = [2, 32], strides = [1, 1]} : vector<2x128xf32> to vector<2x32xf32>
    %320 = arith.negf %319 : vector<2x32xf32>
    %321 = math.exp %320 : vector<2x32xf32>
    %cst_73 = arith.constant 1.000000e+00 : f32
    %322 = vector.broadcast %cst_73 : f32 to vector<2x32xf32>
    %323 = arith.addf %322, %321 : vector<2x32xf32>
    %324 = arith.divf %322, %323 : vector<2x32xf32>
    %325 = arith.mulf %316, %298 : vector<2x32xf32>
    %326 = arith.mulf %310, %318 : vector<2x32xf32>
    %327 = arith.addf %325, %326 : vector<2x32xf32>
    %328 = math.tanh %327 : vector<2x32xf32>
    %329 = arith.mulf %324, %328 : vector<2x32xf32>
    %330 = vector.extract_strided_slice %269 {offsets = [4, 0], sizes = [2, 128], strides = [1, 1]} : vector<16x128xf32> to vector<2x128xf32>
    %c0_74 = arith.constant 0 : index
    %c0_75 = arith.constant 0 : index
    %331 = vector.load %arg5[%c0_74, %c0_75] : memref<32x128xf32, #tpu.memory_space<vmem>>, vector<32x128xf32>
    %cst_76 = arith.constant dense<0.000000e+00> : vector<2x128xf32>
    %332 = tpu.matmul %329, %331, %cst_76 {dimension_numbers = #tpu.dot_dimension_numbers<[1], [0], [0], [1], [0, 0, 1, 1], [], []>} : vector<2x32xf32>, vector<32x128xf32>, vector<2x128xf32> -> vector<2x128xf32>
    %333 = arith.addf %330, %332 : vector<2x128xf32>
    %334 = vector.extract_strided_slice %333 {offsets = [0, 0], sizes = [2, 32], strides = [1, 1]} : vector<2x128xf32> to vector<2x32xf32>
    %335 = arith.negf %334 : vector<2x32xf32>
    %336 = math.exp %335 : vector<2x32xf32>
    %cst_77 = arith.constant 1.000000e+00 : f32
    %337 = vector.broadcast %cst_77 : f32 to vector<2x32xf32>
    %338 = arith.addf %337, %336 : vector<2x32xf32>
    %339 = arith.divf %337, %338 : vector<2x32xf32>
    %340 = vector.extract_strided_slice %333 {offsets = [0, 32], sizes = [2, 32], strides = [1, 1]} : vector<2x128xf32> to vector<2x32xf32>
    %341 = arith.negf %340 : vector<2x32xf32>
    %342 = math.exp %341 : vector<2x32xf32>
    %cst_78 = arith.constant 1.000000e+00 : f32
    %343 = vector.broadcast %cst_78 : f32 to vector<2x32xf32>
    %344 = arith.addf %343, %342 : vector<2x32xf32>
    %345 = arith.divf %343, %344 : vector<2x32xf32>
    %346 = vector.extract_strided_slice %333 {offsets = [0, 64], sizes = [2, 32], strides = [1, 1]} : vector<2x128xf32> to vector<2x32xf32>
    %347 = math.tanh %346 : vector<2x32xf32>
    %348 = vector.extract_strided_slice %333 {offsets = [0, 96], sizes = [2, 32], strides = [1, 1]} : vector<2x128xf32> to vector<2x32xf32>
    %349 = arith.negf %348 : vector<2x32xf32>
    %350 = math.exp %349 : vector<2x32xf32>
    %cst_79 = arith.constant 1.000000e+00 : f32
    %351 = vector.broadcast %cst_79 : f32 to vector<2x32xf32>
    %352 = arith.addf %351, %350 : vector<2x32xf32>
    %353 = arith.divf %351, %352 : vector<2x32xf32>
    %354 = arith.mulf %345, %327 : vector<2x32xf32>
    %355 = arith.mulf %339, %347 : vector<2x32xf32>
    %356 = arith.addf %354, %355 : vector<2x32xf32>
    %357 = math.tanh %356 : vector<2x32xf32>
    %358 = arith.mulf %353, %357 : vector<2x32xf32>
    %359 = vector.extract_strided_slice %269 {offsets = [6, 0], sizes = [2, 128], strides = [1, 1]} : vector<16x128xf32> to vector<2x128xf32>
    %c0_80 = arith.constant 0 : index
    %c0_81 = arith.constant 0 : index
    %360 = vector.load %arg5[%c0_80, %c0_81] : memref<32x128xf32, #tpu.memory_space<vmem>>, vector<32x128xf32>
    %cst_82 = arith.constant dense<0.000000e+00> : vector<2x128xf32>
    %361 = tpu.matmul %358, %360, %cst_82 {dimension_numbers = #tpu.dot_dimension_numbers<[1], [0], [0], [1], [0, 0, 1, 1], [], []>} : vector<2x32xf32>, vector<32x128xf32>, vector<2x128xf32> -> vector<2x128xf32>
    %362 = arith.addf %359, %361 : vector<2x128xf32>
    %363 = vector.extract_strided_slice %362 {offsets = [0, 0], sizes = [2, 32], strides = [1, 1]} : vector<2x128xf32> to vector<2x32xf32>
    %364 = arith.negf %363 : vector<2x32xf32>
    %365 = math.exp %364 : vector<2x32xf32>
    %cst_83 = arith.constant 1.000000e+00 : f32
    %366 = vector.broadcast %cst_83 : f32 to vector<2x32xf32>
    %367 = arith.addf %366, %365 : vector<2x32xf32>
    %368 = arith.divf %366, %367 : vector<2x32xf32>
    %369 = vector.extract_strided_slice %362 {offsets = [0, 32], sizes = [2, 32], strides = [1, 1]} : vector<2x128xf32> to vector<2x32xf32>
    %370 = arith.negf %369 : vector<2x32xf32>
    %371 = math.exp %370 : vector<2x32xf32>
    %cst_84 = arith.constant 1.000000e+00 : f32
    %372 = vector.broadcast %cst_84 : f32 to vector<2x32xf32>
    %373 = arith.addf %372, %371 : vector<2x32xf32>
    %374 = arith.divf %372, %373 : vector<2x32xf32>
    %375 = vector.extract_strided_slice %362 {offsets = [0, 64], sizes = [2, 32], strides = [1, 1]} : vector<2x128xf32> to vector<2x32xf32>
    %376 = math.tanh %375 : vector<2x32xf32>
    %377 = vector.extract_strided_slice %362 {offsets = [0, 96], sizes = [2, 32], strides = [1, 1]} : vector<2x128xf32> to vector<2x32xf32>
    %378 = arith.negf %377 : vector<2x32xf32>
    %379 = math.exp %378 : vector<2x32xf32>
    %cst_85 = arith.constant 1.000000e+00 : f32
    %380 = vector.broadcast %cst_85 : f32 to vector<2x32xf32>
    %381 = arith.addf %380, %379 : vector<2x32xf32>
    %382 = arith.divf %380, %381 : vector<2x32xf32>
    %383 = arith.mulf %374, %356 : vector<2x32xf32>
    %384 = arith.mulf %368, %376 : vector<2x32xf32>
    %385 = arith.addf %383, %384 : vector<2x32xf32>
    %386 = math.tanh %385 : vector<2x32xf32>
    %387 = arith.mulf %382, %386 : vector<2x32xf32>
    %388 = vector.extract_strided_slice %269 {offsets = [8, 0], sizes = [2, 128], strides = [1, 1]} : vector<16x128xf32> to vector<2x128xf32>
    %c0_86 = arith.constant 0 : index
    %c0_87 = arith.constant 0 : index
    %389 = vector.load %arg5[%c0_86, %c0_87] : memref<32x128xf32, #tpu.memory_space<vmem>>, vector<32x128xf32>
    %cst_88 = arith.constant dense<0.000000e+00> : vector<2x128xf32>
    %390 = tpu.matmul %387, %389, %cst_88 {dimension_numbers = #tpu.dot_dimension_numbers<[1], [0], [0], [1], [0, 0, 1, 1], [], []>} : vector<2x32xf32>, vector<32x128xf32>, vector<2x128xf32> -> vector<2x128xf32>
    %391 = arith.addf %388, %390 : vector<2x128xf32>
    %392 = vector.extract_strided_slice %391 {offsets = [0, 0], sizes = [2, 32], strides = [1, 1]} : vector<2x128xf32> to vector<2x32xf32>
    %393 = arith.negf %392 : vector<2x32xf32>
    %394 = math.exp %393 : vector<2x32xf32>
    %cst_89 = arith.constant 1.000000e+00 : f32
    %395 = vector.broadcast %cst_89 : f32 to vector<2x32xf32>
    %396 = arith.addf %395, %394 : vector<2x32xf32>
    %397 = arith.divf %395, %396 : vector<2x32xf32>
    %398 = vector.extract_strided_slice %391 {offsets = [0, 32], sizes = [2, 32], strides = [1, 1]} : vector<2x128xf32> to vector<2x32xf32>
    %399 = arith.negf %398 : vector<2x32xf32>
    %400 = math.exp %399 : vector<2x32xf32>
    %cst_90 = arith.constant 1.000000e+00 : f32
    %401 = vector.broadcast %cst_90 : f32 to vector<2x32xf32>
    %402 = arith.addf %401, %400 : vector<2x32xf32>
    %403 = arith.divf %401, %402 : vector<2x32xf32>
    %404 = vector.extract_strided_slice %391 {offsets = [0, 64], sizes = [2, 32], strides = [1, 1]} : vector<2x128xf32> to vector<2x32xf32>
    %405 = math.tanh %404 : vector<2x32xf32>
    %406 = vector.extract_strided_slice %391 {offsets = [0, 96], sizes = [2, 32], strides = [1, 1]} : vector<2x128xf32> to vector<2x32xf32>
    %407 = arith.negf %406 : vector<2x32xf32>
    %408 = math.exp %407 : vector<2x32xf32>
    %cst_91 = arith.constant 1.000000e+00 : f32
    %409 = vector.broadcast %cst_91 : f32 to vector<2x32xf32>
    %410 = arith.addf %409, %408 : vector<2x32xf32>
    %411 = arith.divf %409, %410 : vector<2x32xf32>
    %412 = arith.mulf %403, %385 : vector<2x32xf32>
    %413 = arith.mulf %397, %405 : vector<2x32xf32>
    %414 = arith.addf %412, %413 : vector<2x32xf32>
    %415 = math.tanh %414 : vector<2x32xf32>
    %416 = arith.mulf %411, %415 : vector<2x32xf32>
    %417 = vector.extract_strided_slice %269 {offsets = [10, 0], sizes = [2, 128], strides = [1, 1]} : vector<16x128xf32> to vector<2x128xf32>
    %c0_92 = arith.constant 0 : index
    %c0_93 = arith.constant 0 : index
    %418 = vector.load %arg5[%c0_92, %c0_93] : memref<32x128xf32, #tpu.memory_space<vmem>>, vector<32x128xf32>
    %cst_94 = arith.constant dense<0.000000e+00> : vector<2x128xf32>
    %419 = tpu.matmul %416, %418, %cst_94 {dimension_numbers = #tpu.dot_dimension_numbers<[1], [0], [0], [1], [0, 0, 1, 1], [], []>} : vector<2x32xf32>, vector<32x128xf32>, vector<2x128xf32> -> vector<2x128xf32>
    %420 = arith.addf %417, %419 : vector<2x128xf32>
    %421 = vector.extract_strided_slice %420 {offsets = [0, 0], sizes = [2, 32], strides = [1, 1]} : vector<2x128xf32> to vector<2x32xf32>
    %422 = arith.negf %421 : vector<2x32xf32>
    %423 = math.exp %422 : vector<2x32xf32>
    %cst_95 = arith.constant 1.000000e+00 : f32
    %424 = vector.broadcast %cst_95 : f32 to vector<2x32xf32>
    %425 = arith.addf %424, %423 : vector<2x32xf32>
    %426 = arith.divf %424, %425 : vector<2x32xf32>
    %427 = vector.extract_strided_slice %420 {offsets = [0, 32], sizes = [2, 32], strides = [1, 1]} : vector<2x128xf32> to vector<2x32xf32>
    %428 = arith.negf %427 : vector<2x32xf32>
    %429 = math.exp %428 : vector<2x32xf32>
    %cst_96 = arith.constant 1.000000e+00 : f32
    %430 = vector.broadcast %cst_96 : f32 to vector<2x32xf32>
    %431 = arith.addf %430, %429 : vector<2x32xf32>
    %432 = arith.divf %430, %431 : vector<2x32xf32>
    %433 = vector.extract_strided_slice %420 {offsets = [0, 64], sizes = [2, 32], strides = [1, 1]} : vector<2x128xf32> to vector<2x32xf32>
    %434 = math.tanh %433 : vector<2x32xf32>
    %435 = vector.extract_strided_slice %420 {offsets = [0, 96], sizes = [2, 32], strides = [1, 1]} : vector<2x128xf32> to vector<2x32xf32>
    %436 = arith.negf %435 : vector<2x32xf32>
    %437 = math.exp %436 : vector<2x32xf32>
    %cst_97 = arith.constant 1.000000e+00 : f32
    %438 = vector.broadcast %cst_97 : f32 to vector<2x32xf32>
    %439 = arith.addf %438, %437 : vector<2x32xf32>
    %440 = arith.divf %438, %439 : vector<2x32xf32>
    %441 = arith.mulf %432, %414 : vector<2x32xf32>
    %442 = arith.mulf %426, %434 : vector<2x32xf32>
    %443 = arith.addf %441, %442 : vector<2x32xf32>
    %444 = math.tanh %443 : vector<2x32xf32>
    %445 = arith.mulf %440, %444 : vector<2x32xf32>
    %446 = vector.extract_strided_slice %269 {offsets = [12, 0], sizes = [2, 128], strides = [1, 1]} : vector<16x128xf32> to vector<2x128xf32>
    %c0_98 = arith.constant 0 : index
    %c0_99 = arith.constant 0 : index
    %447 = vector.load %arg5[%c0_98, %c0_99] : memref<32x128xf32, #tpu.memory_space<vmem>>, vector<32x128xf32>
    %cst_100 = arith.constant dense<0.000000e+00> : vector<2x128xf32>
    %448 = tpu.matmul %445, %447, %cst_100 {dimension_numbers = #tpu.dot_dimension_numbers<[1], [0], [0], [1], [0, 0, 1, 1], [], []>} : vector<2x32xf32>, vector<32x128xf32>, vector<2x128xf32> -> vector<2x128xf32>
    %449 = arith.addf %446, %448 : vector<2x128xf32>
    %450 = vector.extract_strided_slice %449 {offsets = [0, 0], sizes = [2, 32], strides = [1, 1]} : vector<2x128xf32> to vector<2x32xf32>
    %451 = arith.negf %450 : vector<2x32xf32>
    %452 = math.exp %451 : vector<2x32xf32>
    %cst_101 = arith.constant 1.000000e+00 : f32
    %453 = vector.broadcast %cst_101 : f32 to vector<2x32xf32>
    %454 = arith.addf %453, %452 : vector<2x32xf32>
    %455 = arith.divf %453, %454 : vector<2x32xf32>
    %456 = vector.extract_strided_slice %449 {offsets = [0, 32], sizes = [2, 32], strides = [1, 1]} : vector<2x128xf32> to vector<2x32xf32>
    %457 = arith.negf %456 : vector<2x32xf32>
    %458 = math.exp %457 : vector<2x32xf32>
    %cst_102 = arith.constant 1.000000e+00 : f32
    %459 = vector.broadcast %cst_102 : f32 to vector<2x32xf32>
    %460 = arith.addf %459, %458 : vector<2x32xf32>
    %461 = arith.divf %459, %460 : vector<2x32xf32>
    %462 = vector.extract_strided_slice %449 {offsets = [0, 64], sizes = [2, 32], strides = [1, 1]} : vector<2x128xf32> to vector<2x32xf32>
    %463 = math.tanh %462 : vector<2x32xf32>
    %464 = vector.extract_strided_slice %449 {offsets = [0, 96], sizes = [2, 32], strides = [1, 1]} : vector<2x128xf32> to vector<2x32xf32>
    %465 = arith.negf %464 : vector<2x32xf32>
    %466 = math.exp %465 : vector<2x32xf32>
    %cst_103 = arith.constant 1.000000e+00 : f32
    %467 = vector.broadcast %cst_103 : f32 to vector<2x32xf32>
    %468 = arith.addf %467, %466 : vector<2x32xf32>
    %469 = arith.divf %467, %468 : vector<2x32xf32>
    %470 = arith.mulf %461, %443 : vector<2x32xf32>
    %471 = arith.mulf %455, %463 : vector<2x32xf32>
    %472 = arith.addf %470, %471 : vector<2x32xf32>
    %473 = math.tanh %472 : vector<2x32xf32>
    %474 = arith.mulf %469, %473 : vector<2x32xf32>
    %475 = vector.extract_strided_slice %269 {offsets = [14, 0], sizes = [2, 128], strides = [1, 1]} : vector<16x128xf32> to vector<2x128xf32>
    %c0_104 = arith.constant 0 : index
    %c0_105 = arith.constant 0 : index
    %476 = vector.load %arg5[%c0_104, %c0_105] : memref<32x128xf32, #tpu.memory_space<vmem>>, vector<32x128xf32>
    %cst_106 = arith.constant dense<0.000000e+00> : vector<2x128xf32>
    %477 = tpu.matmul %474, %476, %cst_106 {dimension_numbers = #tpu.dot_dimension_numbers<[1], [0], [0], [1], [0, 0, 1, 1], [], []>} : vector<2x32xf32>, vector<32x128xf32>, vector<2x128xf32> -> vector<2x128xf32>
    %478 = arith.addf %475, %477 : vector<2x128xf32>
    %479 = vector.extract_strided_slice %478 {offsets = [0, 0], sizes = [2, 32], strides = [1, 1]} : vector<2x128xf32> to vector<2x32xf32>
    %480 = arith.negf %479 : vector<2x32xf32>
    %481 = math.exp %480 : vector<2x32xf32>
    %cst_107 = arith.constant 1.000000e+00 : f32
    %482 = vector.broadcast %cst_107 : f32 to vector<2x32xf32>
    %483 = arith.addf %482, %481 : vector<2x32xf32>
    %484 = arith.divf %482, %483 : vector<2x32xf32>
    %485 = vector.extract_strided_slice %478 {offsets = [0, 32], sizes = [2, 32], strides = [1, 1]} : vector<2x128xf32> to vector<2x32xf32>
    %486 = arith.negf %485 : vector<2x32xf32>
    %487 = math.exp %486 : vector<2x32xf32>
    %cst_108 = arith.constant 1.000000e+00 : f32
    %488 = vector.broadcast %cst_108 : f32 to vector<2x32xf32>
    %489 = arith.addf %488, %487 : vector<2x32xf32>
    %490 = arith.divf %488, %489 : vector<2x32xf32>
    %491 = vector.extract_strided_slice %478 {offsets = [0, 64], sizes = [2, 32], strides = [1, 1]} : vector<2x128xf32> to vector<2x32xf32>
    %492 = math.tanh %491 : vector<2x32xf32>
    %493 = vector.extract_strided_slice %478 {offsets = [0, 96], sizes = [2, 32], strides = [1, 1]} : vector<2x128xf32> to vector<2x32xf32>
    %494 = arith.negf %493 : vector<2x32xf32>
    %495 = math.exp %494 : vector<2x32xf32>
    %cst_109 = arith.constant 1.000000e+00 : f32
    %496 = vector.broadcast %cst_109 : f32 to vector<2x32xf32>
    %497 = arith.addf %496, %495 : vector<2x32xf32>
    %498 = arith.divf %496, %497 : vector<2x32xf32>
    %499 = arith.mulf %490, %472 : vector<2x32xf32>
    %500 = arith.mulf %484, %492 : vector<2x32xf32>
    %501 = arith.addf %499, %500 : vector<2x32xf32>
    %502 = math.tanh %501 : vector<2x32xf32>
    %503 = arith.mulf %498, %502 : vector<2x32xf32>
    %c0_110 = arith.constant 0 : index
    %c0_111 = arith.constant 0 : index
    %504 = vector.load %arg7[%c0_110, %c0_111] : memref<64x128xf32, #tpu.memory_space<vmem>>, vector<64x128xf32>
    %cst_112 = arith.constant dense<0.000000e+00> : vector<2x128xf32>
    %505 = tpu.matmul %263, %504, %cst_112 {dimension_numbers = #tpu.dot_dimension_numbers<[1], [0], [0], [1], [0, 0, 1, 1], [], []>} : vector<2x64xf32>, vector<64x128xf32>, vector<2x128xf32> -> vector<2x128xf32>
    %c0_113 = arith.constant 0 : index
    %c0_114 = arith.constant 0 : index
    %506 = vector.load %arg8[%c0_113, %c0_114] : memref<1x128xf32, #tpu.memory_space<vmem>>, vector<1x128xf32>
    %507 = vector.broadcast %506 : vector<1x128xf32> to vector<2x128xf32>
    %508 = arith.addf %505, %507 : vector<2x128xf32>
    %cst_115 = arith.constant 0.000000e+00 : f32
    %509 = vector.broadcast %cst_115 : f32 to vector<2x32xf32>
    %510 = vector.extract_strided_slice %508 {offsets = [0, 0], sizes = [2, 32], strides = [1, 1]} : vector<2x128xf32> to vector<2x32xf32>
    %511 = arith.negf %510 : vector<2x32xf32>
    %512 = math.exp %511 : vector<2x32xf32>
    %cst_116 = arith.constant 1.000000e+00 : f32
    %513 = vector.broadcast %cst_116 : f32 to vector<2x32xf32>
    %514 = arith.addf %513, %512 : vector<2x32xf32>
    %515 = arith.divf %513, %514 : vector<2x32xf32>
    %516 = vector.extract_strided_slice %508 {offsets = [0, 32], sizes = [2, 32], strides = [1, 1]} : vector<2x128xf32> to vector<2x32xf32>
    %517 = arith.negf %516 : vector<2x32xf32>
    %518 = math.exp %517 : vector<2x32xf32>
    %cst_117 = arith.constant 1.000000e+00 : f32
    %519 = vector.broadcast %cst_117 : f32 to vector<2x32xf32>
    %520 = arith.addf %519, %518 : vector<2x32xf32>
    %521 = arith.divf %519, %520 : vector<2x32xf32>
    %522 = vector.extract_strided_slice %508 {offsets = [0, 64], sizes = [2, 32], strides = [1, 1]} : vector<2x128xf32> to vector<2x32xf32>
    %523 = math.tanh %522 : vector<2x32xf32>
    %524 = vector.extract_strided_slice %508 {offsets = [0, 96], sizes = [2, 32], strides = [1, 1]} : vector<2x128xf32> to vector<2x32xf32>
    %525 = arith.negf %524 : vector<2x32xf32>
    %526 = math.exp %525 : vector<2x32xf32>
    %cst_118 = arith.constant 1.000000e+00 : f32
    %527 = vector.broadcast %cst_118 : f32 to vector<2x32xf32>
    %528 = arith.addf %527, %526 : vector<2x32xf32>
    %529 = arith.divf %527, %528 : vector<2x32xf32>
    %530 = arith.mulf %521, %509 : vector<2x32xf32>
    %531 = arith.mulf %515, %523 : vector<2x32xf32>
    %532 = arith.addf %530, %531 : vector<2x32xf32>
    %533 = math.tanh %532 : vector<2x32xf32>
    %534 = arith.mulf %529, %533 : vector<2x32xf32>
    %535 = tpu.concatenate %503, %534 in 1 : vector<2x32xf32>, vector<2x32xf32> -> vector<2x64xf32>
    %c0_119 = arith.constant 0 : index
    %c0_120 = arith.constant 0 : index
    %536 = vector.load %arg9[%c0_119, %c0_120] : memref<64x2xf32, #tpu.memory_space<vmem>>, vector<64x2xf32>
    %cst_121 = arith.constant dense<0.000000e+00> : vector<2x2xf32>
    %537 = tpu.matmul %535, %536, %cst_121 {dimension_numbers = #tpu.dot_dimension_numbers<[1], [0], [0], [1], [0, 0, 1, 1], [], []>} : vector<2x64xf32>, vector<64x2xf32>, vector<2x2xf32> -> vector<2x2xf32>
    %c0_122 = arith.constant 0 : index
    %c0_123 = arith.constant 0 : index
    %538 = vector.load %arg10[%c0_122, %c0_123] : memref<1x2xf32, #tpu.memory_space<vmem>>, vector<1x2xf32>
    %539 = vector.broadcast %538 : vector<1x2xf32> to vector<2x2xf32>
    %540 = arith.addf %537, %539 : vector<2x2xf32>
    %c0_124 = arith.constant 0 : index
    %c0_125 = arith.constant 0 : index
    %541 = vector.load %arg11[%c0_124, %c0_125] : memref<2x2xf32, #tpu.memory_space<vmem>>, vector<2x2xf32>
    tpu.vector_store %arg11[%c0_124, %c0_125], %540 {strides = array<i32>} : memref<2x2xf32, #tpu.memory_space<vmem>>, vector<2x2xf32>,
    return
  }
}

</mosaic_0001>

<bundles_post_ra>
// kernel: tpu_custom_call.1
= control target key start
LH: loop header
LB: loop body
LE: loop exit
PB: predicated region body
PF: predicated region fallthrough
CT: control target
= control target key end

     0   :  { %16 = vsyncpa [#allocation3], 0  ;;  %s3541_s0 = inlined_call_operand.hbm [shape: f32[16,64], index: 0, kind: input, shape index: {}]   ;;  %s3542_s1 = inlined_call_operand.hbm [shape: f32[64,256], index: 1, kind: input, shape index: {}]   ;;  %s3543_s2 = inlined_call_operand.hbm [shape: f32[64,256], index: 2, kind: input, shape index: {}]   ;;  %s3544_s3 = inlined_call_operand.vmem [shape: f32[1,256], index: 3, kind: input, shape index: {}]   ;;  %s3545_s4 = inlined_call_operand.vmem [shape: f32[64,128], index: 4, kind: input, shape index: {}]   ;;  %s3546_s5 = inlined_call_operand.hbm [shape: f32[32,128], index: 5, kind: input, shape index: {}]   ;;  %s3547_s6 = inlined_call_operand.vmem [shape: f32[1,128], index: 6, kind: input, shape index: {}]   ;;  %s3548_s7 = inlined_call_operand.hbm [shape: f32[64,128], index: 7, kind: input, shape index: {}]   ;;  %s3549_s8 = inlined_call_operand.vmem [shape: f32[1,128], index: 8, kind: input, shape index: {}]   ;;  %s3550_s9 = inlined_call_operand.vmem [shape: f32[64,2], index: 9, kind: input, shape index: {}]   ;;  %s3551_s10 = inlined_call_operand.vmem [shape: f32[1,2], index: 10, kind: input, shape index: {}]   ;;  %s3552_s11 = inlined_call_operand.hbm [shape: f32[2,2], index: 11, kind: output, shape index: {}]  }
   0x1   :  { %17 = vsyncpa [#allocation6], 0 }
   0x2   :  { %18 = vsyncpa [#allocation9], 0 }
   0x3   :  { %19 = vsyncpa [#allocation4], 0  ;;  %s2908_s17 = smov [#allocation5]  }
   0x4   :  { %s37_s18 = sshll.u32 %s2908_s17, 4  ;;  %s38_s18 = int_to_ptr.vmem [resolvable:$true] %s37_s18 }
   0x5   :  { %s2788_s19 = scalar_lea.vmem %s38_s18, 2048  ;;  %p2793_p1 = scmp.lt.s32.totalorder %s38_s18, %s38_s18 }
   0x6   :  { %p2789_p0 = scmp.ne.s32.totalorder %s38_s18, %s2788_s19  ;;  %p2794_p2 = scmp.lt.s32.totalorder %s2788_s19, %s2788_s19 }
   0x8   :  { %p2795_p3 = por %p2794_p2, %p2793_p1 }
   0xa   :  { %p2796_p4 = pnand %p2795_p3, %p2789_p0 }
   0xc   :  { %2799 = shalt.err (!%p2796_p4)
}
   0xd   :  { %s2909_s20 = smov 256   ;;  %s2910_s21 = smov 16  }
   0xe   :  { %43 = dma.hbm_to_vmem [thread:$0]  %s3542_s1, 2048, %s38_s18, [#allocation6], %s2909_s20, %s2909_s20, %s2910_s21  }
   0xf   :  { %s2911_s24 = smov [#allocation8]   ;;  %s2912_s26 = smov [#allocation2]  }
  0x10   :  { %s65_s25 = sshll.u32 %s2911_s24, 4  ;;  %s25_s27 = sshll.u32 %s2912_s26, 4  ;;  %s66_s25 = int_to_ptr.vmem [resolvable:$true] %s65_s25  ;;  %s26_s27 = int_to_ptr.vmem [resolvable:$true] %s25_s27 }
  0x11   :  { %s2808_s28 = scalar_lea.vmem %s66_s25, 512  ;;  %p2813_p6 = scmp.lt.s32.totalorder %s66_s25, %s66_s25 }
  0x12   :  { %p2809_p5 = scmp.ne.s32.totalorder %s66_s25, %s2808_s28  ;;  %p2814_p7 = scmp.lt.s32.totalorder %s2808_s28, %s2808_s28 }
  0x14   :  { %p2815_p8 = por %p2814_p7, %p2813_p6 }
  0x16   :  { %p2816_p9 = pnand %p2815_p8, %p2809_p5 }
  0x18   :  { %2819 = shalt.err (!%p2816_p9)
}
  0x19   :  { %s2913_s29 = smov 128   ;;  %s2914_s30 = smov 8  }
  0x1a   :  { %71 = dma.hbm_to_vmem [thread:$0]  %s3546_s5, 512, %s66_s25, [#allocation9], %s2913_s29, %s2913_s29, %s2914_s30  }
  0x1b   :  { %s2828_s1 = scalar_lea.vmem %s26_s27, 256  ;;  %p2833_p11 = scmp.lt.s32.totalorder %s26_s27, %s26_s27 }
  0x1c   :  { %p2829_p10 = scmp.ne.s32.totalorder %s26_s27, %s2828_s1  ;;  %p2834_p12 = scmp.lt.s32.totalorder %s2828_s1, %s2828_s1 }
  0x1e   :  { %p2835_p13 = por %p2834_p12, %p2833_p11 }
  0x20   :  { %p2836_p0 = pnand %p2835_p13, %p2829_p10 }
  0x22   :  { %2839 = shalt.err (!%p2836_p0)
}
  0x23   :  { %31 = dma.hbm_to_vmem [thread:$0]  %s3541_s0, 256, %s26_s27, [#allocation3], %s2913_s29, %s2913_s29, %s2914_s30  }
  0x24   :  { %s2915_s16 = smov [#allocation7]   ;;  %s2916_s18 = smov [#allocation10]  }
  0x25   :  { %s49_s17 = sshll.u32 %s2915_s16, 4  ;;  %s79_s5 = sshll.u32 %s2916_s18, 4  ;;  %s50_s17 = int_to_ptr.vmem [resolvable:$true] %s49_s17  ;;  %s80_s5 = int_to_ptr.vmem [resolvable:$true] %s79_s5 }
  0x26   :  { %s2848_s19 = scalar_lea.vmem %s50_s17, 2048  ;;  %p2853_p2 = scmp.lt.s32.totalorder %s50_s17, %s50_s17 }
  0x27   :  { %p2849_p1 = scmp.ne.s32.totalorder %s50_s17, %s2848_s19  ;;  %p2854_p3 = scmp.lt.s32.totalorder %s2848_s19, %s2848_s19 }
  0x29   :  { %p2855_p4 = por %p2854_p3, %p2853_p2 }
  0x2b   :  { %p2856_p5 = pnand %p2855_p4, %p2849_p1 }
  0x2d   :  { %2859 = shalt.err (!%p2856_p5)
}
  0x2e   :  { %55 = dma.hbm_to_vmem [thread:$0]  %s3543_s2, 2048, %s50_s17, [#allocation6], %s2909_s20, %s2909_s20, %s2910_s21  }
  0x2f   :  { %s2868_s0 = scalar_lea.vmem %s80_s5, 1024  ;;  %p2873_p7 = scmp.lt.s32.totalorder %s80_s5, %s80_s5 }
  0x30   :  { %p2869_p6 = scmp.ne.s32.totalorder %s80_s5, %s2868_s0  ;;  %p2874_p8 = scmp.lt.s32.totalorder %s2868_s0, %s2868_s0 }
  0x32   :  { %p2875_p9 = por %p2874_p8, %p2873_p7 }
  0x34   :  { %p2876_p10 = pnand %p2875_p9, %p2869_p6 }
  0x36   :  { %2879 = shalt.err (!%p2876_p10)
}
  0x37   :  { %85 = dma.hbm_to_vmem [thread:$0]  %s3548_s7, 1024, %s80_s5, [#allocation9], %s2913_s29, %s2913_s29, %s2914_s30  }
  0x38   :  { %2900 = dma.done.wait [#allocation3], 256  }
  0x39   :  { %2901 = vsyncadd [#allocation3], 4294967040 }
  0x3a   :  { %2902 = dma.done.wait [#allocation6], 4096  }
  0x3b   :  { %2903 = vsyncadd [#allocation6], 4294963200 }
  0x3c   :  { %2904 = dma.done.wait [#allocation9], 1536  }
  0x3d   :  { %2905 = vsyncadd [#allocation9], 4294965760  ;;  %v2917_v0 = vmov 0.0   ;;  %v124_v1 = vld [vmem:[#allocation5 + $0x78] sm:$0xff]  ;;  %v123_v3 = vld [vmem:[#allocation5 + $0x70] sm:$0xff]  ;;  %vm137_vm0 = vcmask 523264   ;;  %v127_v34 = vlaneseq }
  0x3e   :  { %208 = vmatprep.mubr.f32.mxu0 %v2917_v0  ;;  %304 = vmatprep.mubr.f32.mxu1 %v2917_v0  ;;  %v3014_v2 = vld [vmem:[#allocation7 + $0x78] sm:$0xff]  ;;  %v3017_v4 = vld [vmem:[#allocation7 + $0x70] sm:$0xff]  ;;  %v122_v5 = vld [vmem:[#allocation5 + $0x68] sm:$0xff]  ;;  %vm2919_vm1 = vmmov 0   ;;  %vm1103_vm2 = vcmask 261120   ;;  %vm1156_vm3 = vcmask 1041408  }
  0x3f   :  { %160 = vmatprep.subr.mxu0 %v124_v1  ;;  %256 = vmatprep.subr.mxu1 %v3014_v2  ;;  %v3019_v6 = vld [vmem:[#allocation7 + $0x68] sm:$0xff]  ;;  %v121_v7 = vld [vmem:[#allocation5 + $0x60] sm:$0xff]  ;;  %v120_v9 = vld [vmem:[#allocation5 + $0x58] sm:$0xff]  ;;  %v128_v35 = vshrl.u32 %v127_v34, 7  ;;  %vm1160_vm4 = vcmask 1045504   ;;  %vm1158_vm5 = vcmask 1043456  }
  0x40   :  { %161 = vmatpush1.msra.mxu0 %v123_v3  ;;  %257 = vmatpush1.msra.mxu1 %v3017_v4  ;;  %v3022_v8 = vld [vmem:[#allocation7 + $0x60] sm:$0xff]  ;;  %v3025_v10 = vld [vmem:[#allocation7 + $0x58] sm:$0xff]  ;;  %v119_v11 = vld [vmem:[#allocation5 + $0x50] sm:$0xff]  ;;  %s2921_s15 = smov [#allocation11]   ;;  %vm2318_vm6 = vcmask 9216  }
  0x41   :  { %162 = vmatprep.subr.mxu0 %v122_v5  ;;  %258 = vmatprep.subr.mxu1 %v3019_v6  ;;  %v3027_v12 = vld [vmem:[#allocation7 + $0x50] sm:$0xff]  ;;  %v118_v13 = vld [vmem:[#allocation5 + $0x48] sm:$0xff]  ;;  %v117_v15 = vld [vmem:[#allocation5 + $0x40] sm:$0xff]  ;;  %v129_v36 = vsub.s32 0, %v128_v35  ;;  %v133_v44 = vsub.s32 1, %v128_v35 }
  0x42   :  { %163 = vmatpush1.msra.mxu0 %v121_v7  ;;  %259 = vmatpush1.msra.mxu1 %v3022_v8  ;;  %v3030_v14 = vld [vmem:[#allocation7 + $0x48] sm:$0xff]  ;;  %v3033_v16 = vld [vmem:[#allocation7 + $0x40] sm:$0xff]  ;;  %v116_v17 = vld [vmem:[#allocation5 + $0x38] sm:$0xff] }
  0x43   :  { %164 = vmatprep.subr.mxu0 %v120_v9  ;;  %260 = vmatprep.subr.mxu1 %v3025_v10  ;;  %v3036_v18 = vld [vmem:[#allocation7 + $0x38] sm:$0xff]  ;;  %v115_v19 = vld [vmem:[#allocation5 + $0x30] sm:$0xff]  ;;  %v114_v21 = vld [vmem:[#allocation5 + $0x28] sm:$0xff] }
  0x44   :  { %165 = vmatpush1.msra.mxu0 %v119_v11  ;;  %261 = vmatpush1.msra.mxu1 %v3027_v12  ;;  %v3039_v20 = vld [vmem:[#allocation7 + $0x30] sm:$0xff]  ;;  %v3042_v22 = vld [vmem:[#allocation7 + $0x28] sm:$0xff]  ;;  %v113_v23 = vld [vmem:[#allocation5 + $0x20] sm:$0xff] }
  0x45   :  { %166 = vmatprep.subr.mxu0 %v118_v13  ;;  %262 = vmatprep.subr.mxu1 %v3030_v14  ;;  %v3045_v24 = vld [vmem:[#allocation7 + $0x20] sm:$0xff]  ;;  %v112_v25 = vld [vmem:[#allocation5 + $0x18] sm:$0xff]  ;;  %v111_v27 = vld [vmem:[#allocation5 + $0x10] sm:$0xff] }
  0x46   :  { %167 = vmatpush1.msra.mxu0 %v117_v15  ;;  %263 = vmatpush1.msra.mxu1 %v3033_v16  ;;  %v3048_v26 = vld [vmem:[#allocation7 + $0x18] sm:$0xff]  ;;  %v3051_v28 = vld [vmem:[#allocation7 + $0x10] sm:$0xff]  ;;  %v110_v29 = vld [vmem:[#allocation5 + $0x8] sm:$0xff] }
  0x47   :  { %168 = vmatprep.subr.mxu0 %v116_v17  ;;  %264 = vmatprep.subr.mxu1 %v3036_v18  ;;  %v3054_v30 = vld [vmem:[#allocation7 + $0x8] sm:$0xff]  ;;  %v109_v31 = vld [vmem:[#allocation5] sm:$0xff]  ;;  %v107_v33 = vld [vmem:[#allocation2] sm:$0xff] }
  0x48   :  { %169 = vmatpush1.msra.mxu0 %v115_v19  ;;  %265 = vmatpush1.msra.mxu1 %v3039_v20  ;;  %v3057_v32 = vld [vmem:[#allocation7] sm:$0xff]  ;;  %v125_v37 = vld [vmem:[%s3544_s3] sm:$0x3]  ;;  %s2918_s3 = smov 64   ;;  %v108_v55 = vld [vmem:[#allocation2 + $0x8] sm:$0xff] }
  0x49   :  { %170 = vmatprep.subr.mxu0 %v114_v21  ;;  %266 = vmatprep.subr.mxu1 %v3042_v22  ;;  %v3103_v38 = vrot.slane %v125_v37, %v129_v36  ;;  %v3109_v45 = vrot.slane %v125_v37, %v133_v44 }
  0x4a   :  { %171 = vmatpush1.msra.mxu0 %v113_v23  ;;  %267 = vmatpush1.msra.mxu1 %v3045_v24 }
  0x4b   :  { %172 = vmatprep.subr.mxu0 %v112_v25  ;;  %268 = vmatprep.subr.mxu1 %v3048_v26 }
  0x4c   :  { %173 = vmatpush1.msra.mxu0 %v111_v27  ;;  %269 = vmatpush1.msra.mxu1 %v3051_v28 }
  0x4d   :  { %174 = vmatprep.subr.mxu0 %v110_v29  ;;  %270 = vmatprep.subr.mxu1 %v3054_v30 }
  0x4e   :  { %175 = vmatpush1.msra.mxu0 %v109_v31  ;;  %271 = vmatpush1.msra.mxu1 %v3057_v32 }
  0x4f   :  { %2337 = vmatmul.mubr.msk.f32.vlgmr.msra.gmra.mxu0 %vm137_vm0, %v107_v33  ;;  %305 = vmatmul.mubr.f32.vlgmr.msra.gmra.mxu1 %v2917_v0 }
  0x50   :  { %356 = vmatprep.subr.mxu0 %v3014_v2  ;;  %214 = vmatprep.mubr.f32.mxu0 %v2917_v0 }
  0x51   :  { %357 = vmatpush1.msra.mxu0 %v3017_v4  ;;  %466 = vmatprep.subr.mxu1 %v3014_v2 }
  0x52   :  { %358 = vmatprep.subr.mxu0 %v3019_v6  ;;  %467 = vmatpush1.msra.mxu1 %v3017_v4 }
  0x53   :  { %359 = vmatpush1.msra.mxu0 %v3022_v8  ;;  %468 = vmatprep.subr.mxu1 %v3019_v6 }
  0x54   :  { %360 = vmatprep.subr.mxu0 %v3025_v10  ;;  %469 = vmatpush1.msra.mxu1 %v3022_v8 }
  0x55   :  { %361 = vmatpush1.msra.mxu0 %v3027_v12  ;;  %470 = vmatprep.subr.mxu1 %v3025_v10 }
  0x56   :  { %362 = vmatprep.subr.mxu0 %v3030_v14  ;;  %471 = vmatpush1.msra.mxu1 %v3027_v12 }
  0x57   :  { %363 = vmatpush1.msra.mxu0 %v3033_v16  ;;  %472 = vmatprep.subr.mxu1 %v3030_v14 }
  0x58   :  { %364 = vmatprep.subr.mxu0 %v3036_v18  ;;  %473 = vmatpush1.msra.mxu1 %v3033_v16 }
  0x59   :  { %365 = vmatpush1.msra.mxu0 %v3039_v20  ;;  %474 = vmatprep.subr.mxu1 %v3036_v18 }
  0x5a   :  { %366 = vmatprep.subr.mxu0 %v3042_v22  ;;  %475 = vmatpush1.msra.mxu1 %v3039_v20 }
  0x5b   :  { %367 = vmatpush1.msra.mxu0 %v3045_v24  ;;  %476 = vmatprep.subr.mxu1 %v3042_v22 }
  0x5c   :  { %368 = vmatprep.subr.mxu0 %v3048_v26  ;;  %477 = vmatpush1.msra.mxu1 %v3045_v24 }
  0x5d   :  { %369 = vmatpush1.msra.mxu0 %v3051_v28  ;;  %478 = vmatprep.subr.mxu1 %v3048_v26 }
  0x5e   :  { %370 = vmatprep.subr.mxu0 %v3054_v30  ;;  %479 = vmatpush1.msra.mxu1 %v3051_v28 }
  0x5f   :  { %371 = vmatpush1.msra.mxu0 %v3057_v32  ;;  %480 = vmatprep.subr.mxu1 %v3054_v30 }
  0x60   :  { %481 = vmatpush1.msra.mxu1 %v3057_v32  ;;  %514 = vmatprep.mubr.f32.mxu1 %v2917_v0 }
  0x61   :  { %576 = vmatprep.subr.mxu0 %v3014_v2  ;;  %686 = vmatprep.subr.mxu1 %v3014_v2 }
  0x62   :  { %2338 = vmatmul.mubr.msk.f32.gmra.mxu0 %vm137_vm0, %v108_v55 }
  0x63   :  { %404 = vmatprep.mubr.f32.mxu0 %v2917_v0 }
 0x10f   :  { %v210_v39 = vpop.f32.mrf.mxu0  ;;  %v306_v41 = vpop.f32.mrf.mxu1 }
 0x110   :  { %v3106_v40 = vadd.f32 %v210_v39, %v3103_v38 }
 0x111   :  { %v212_v46 = vpop.f32.mrf.mxu0  ;;  %v308_v48 = vpop.f32.mrf.mxu1 }
 0x112   :  { %v311_v42 = vadd.f32 %v306_v41, %v3106_v40  ;;  %v3112_v47 = vadd.f32 %v212_v46, %v3109_v45 }
 0x114   :  { %v2339_v43 = vmul.f32 -1.442695, %v311_v42  ;;  %v312_v49 = vadd.f32 %v308_v48, %v3112_v47 }
 0x116   :  { %2612 = vpow2.f32 %v2339_v43  ;;  %v2340_v56 = vmul.f32 -1.442695, %v312_v49 }
 0x117   :  { %2614 = vtanh.f32 %v312_v49 }
 0x122   :  { %v3143_v5 = vpop.f32.mrf.mxu0 }
 0x123   :  { %v2613_v50 = vpop.eup %2612 }
 0x124   :  { %v316_v51 = vadd.f32 1.0, %v2613_v50  ;;  %v2615_v52 = vpop.eup %2614  ;;  %v3145_v7 = vpop.f32.mrf.mxu0 }
 0x126   :  { %2616 = vrcp.f32 %v316_v51 }
 0x127   :  { %2618 = vpow2.f32 %v2340_v56 }
 0x133   :  { %v2617_v53 = vpop.eup %2616 }
 0x134   :  { %v327_v54 = vmul.f32 %v2617_v53, %v2615_v52  ;;  %v2619_v57 = vpop.eup %2618  ;;  %v326_v59 = vmul.f32 0.0, %v2617_v53 }
 0x135   :  { %v323_v58 = vadd.f32 1.0, %v2619_v57 }
 0x136   :  { %329 = vrot.lane.b32.xlu0 %v327_v54, %s2918_s3 }
 0x137   :  { %2620 = vrcp.f32 %v323_v58 }
 0x144   :  { %v2621_v62 = vpop.eup %2620 }
 0x1a8   :  { %v330_v60 = vpop.permute.xlu0 %329 }
 0x1a9   :  { %v332_v61 = vadd.f32 %v330_v60, %v326_v59 }
 0x1ab   :  { %2622 = vtanh.f32 %v332_v61  ;;  %v433_v29 = vrot.slane %v332_v61, 6 }
 0x1b8   :  { %v2623_v63 = vpop.eup %2622 }
 0x1b9   :  { %v3118_v1 = vmul.f32 %v2623_v63, %v2621_v62 }
 0x1bb   :  { %336 = vrot.lane.b32.xlu0 %v3118_v1, %s2918_s3 }
 0x22d   :  { %v3122_v3 = vpop.permute.xlu0 %336 }
 0x22e   :  { %2341 = vmatmul.mubr.msk.f32.vlgmr.msra.gmra.mxu0 %vm137_vm0, %v3122_v3 }
 0x22f   :  { %577 = vmatpush1.msra.mxu0 %v3017_v4  ;;  %624 = vmatprep.mubr.f32.mxu0 %v2917_v0 }
 0x230   :  { %578 = vmatprep.subr.mxu0 %v3019_v6 }
 0x231   :  { %579 = vmatpush1.msra.mxu0 %v3022_v8 }
 0x232   :  { %580 = vmatprep.subr.mxu0 %v3025_v10 }
 0x233   :  { %581 = vmatpush1.msra.mxu0 %v3027_v12 }
 0x234   :  { %582 = vmatprep.subr.mxu0 %v3030_v14 }
 0x235   :  { %583 = vmatpush1.msra.mxu0 %v3033_v16 }
 0x236   :  { %584 = vmatprep.subr.mxu0 %v3036_v18 }
 0x237   :  { %585 = vmatpush1.msra.mxu0 %v3039_v20 }
 0x238   :  { %586 = vmatprep.subr.mxu0 %v3042_v22 }
 0x239   :  { %587 = vmatpush1.msra.mxu0 %v3045_v24 }
 0x23a   :  { %588 = vmatprep.subr.mxu0 %v3048_v26 }
 0x23b   :  { %589 = vmatpush1.msra.mxu0 %v3051_v28 }
 0x23c   :  { %590 = vmatprep.subr.mxu0 %v3054_v30 }
 0x23d   :  { %591 = vmatpush1.msra.mxu0 %v3057_v32 }
 0x23e   :  { %789 = vmatprep.subr.mxu0 %v3014_v2 }
 0x2ee   :  { %v406_v9 = vpop.f32.mrf.mxu0 }
 0x2ef   :  { %v413_v11 = vrot.slane %v406_v9, 6 }
 0x2f0   :  { %v408_v17 = vpop.f32.mrf.mxu0 }
 0x2f1   :  { %v417_v13 = vadd.f32 %v413_v11, %v3106_v40  ;;  %v414_v19 = vrot.slane %v408_v17, 6 }
 0x2f3   :  { %v2342_v15 = vmul.f32 -1.442695, %v417_v13  ;;  %v418_v21 = vadd.f32 %v414_v19, %v3112_v47 }
 0x2f5   :  { %2624 = vpow2.f32 %v2342_v15  ;;  %v2343_v35 = vmul.f32 -1.442695, %v418_v21 }
 0x2f6   :  { %2626 = vtanh.f32 %v418_v21 }
 0x302   :  { %v2625_v23 = vpop.eup %2624 }
 0x303   :  { %v422_v25 = vadd.f32 1.0, %v2625_v23  ;;  %v2627_v27 = vpop.eup %2626 }
 0x305   :  { %2628 = vrcp.f32 %v422_v25 }
 0x306   :  { %2630 = vpow2.f32 %v2343_v35 }
 0x312   :  { %v2629_v31 = vpop.eup %2628 }
 0x313   :  { %v436_v33 = vmul.f32 %v2629_v31, %v2627_v27  ;;  %v435_v34 = vmul.f32 %v2629_v31, %v433_v29  ;;  %v2631_v36 = vpop.eup %2630 }
 0x314   :  { %v429_v37 = vadd.f32 1.0, %v2631_v36 }
 0x315   :  { %438 = vrot.lane.b32.xlu1 %v436_v33, %s2918_s3 }
 0x316   :  { %2632 = vrcp.f32 %v429_v37 }
 0x323   :  { %v2633_v42 = vpop.eup %2632 }
 0x387   :  { %v439_v39 = vpop.permute.xlu1 %438 }
 0x388   :  { %v441_v41 = vadd.f32 %v439_v39, %v435_v34 }
 0x38a   :  { %2634 = vtanh.f32 %v441_v41  ;;  %v543_v59 = vrot.slane %v441_v41, 6 }
 0x397   :  { %v2635_v43 = vpop.eup %2634 }
 0x398   :  { %v3150_v44 = vmul.f32 %v2635_v43, %v2633_v42 }
 0x39a   :  { %v445_v46 = vrot.slane %v3150_v44, 2 }
 0x39c   :  { %446 = vrot.lane.b32.xlu1 %v445_v46, %s2918_s3 }
 0x40e   :  { %v447_v48 = vpop.permute.xlu1 %446 }
 0x40f   :  { %2344 = vmatmul.mubr.msk.f32.vlgmr.msra.gmra.mxu1 %vm137_vm0, %v447_v48 }
 0x410   :  { %687 = vmatpush1.msra.mxu1 %v3017_v4  ;;  %734 = vmatprep.mubr.f32.mxu1 %v2917_v0 }
 0x411   :  { %688 = vmatprep.subr.mxu1 %v3019_v6 }
 0x412   :  { %689 = vmatpush1.msra.mxu1 %v3022_v8 }
 0x413   :  { %690 = vmatprep.subr.mxu1 %v3025_v10 }
 0x414   :  { %691 = vmatpush1.msra.mxu1 %v3027_v12 }
 0x415   :  { %692 = vmatprep.subr.mxu1 %v3030_v14 }
 0x416   :  { %693 = vmatpush1.msra.mxu1 %v3033_v16 }
 0x417   :  { %694 = vmatprep.subr.mxu1 %v3036_v18 }
 0x418   :  { %695 = vmatpush1.msra.mxu1 %v3039_v20 }
 0x419   :  { %696 = vmatprep.subr.mxu1 %v3042_v22 }
 0x41a   :  { %697 = vmatpush1.msra.mxu1 %v3045_v24 }
 0x41b   :  { %698 = vmatprep.subr.mxu1 %v3048_v26 }
 0x41c   :  { %699 = vmatpush1.msra.mxu1 %v3051_v28 }
 0x41d   :  { %700 = vmatprep.subr.mxu1 %v3054_v30 }
 0x41e   :  { %701 = vmatpush1.msra.mxu1 %v3057_v32 }
 0x41f   :  { %899 = vmatprep.subr.mxu1 %v3014_v2 }
 0x4cf   :  { %v516_v49 = vpop.f32.mrf.mxu1 }
 0x4d0   :  { %v523_v50 = vrot.slane %v516_v49, 4 }
 0x4d1   :  { %v518_v53 = vpop.f32.mrf.mxu1 }
 0x4d2   :  { %v527_v51 = vadd.f32 %v523_v50, %v3106_v40  ;;  %v524_v54 = vrot.slane %v518_v53, 4 }
 0x4d4   :  { %v2345_v52 = vmul.f32 -1.442695, %v527_v51  ;;  %v528_v55 = vadd.f32 %v524_v54, %v3112_v47 }
 0x4d6   :  { %2636 = vpow2.f32 %v2345_v52  ;;  %v2346_v63 = vmul.f32 -1.442695, %v528_v55 }
 0x4d7   :  { %2638 = vtanh.f32 %v528_v55 }
 0x4e3   :  { %v2637_v56 = vpop.eup %2636 }
 0x4e4   :  { %v532_v57 = vadd.f32 1.0, %v2637_v56  ;;  %v2639_v58 = vpop.eup %2638  ;;  %v3226_v56 = vadd.f32 %v3143_v5, %v3103_v38 }
 0x4e6   :  { %2640 = vrcp.f32 %v532_v57 }
 0x4e7   :  { %2642 = vpow2.f32 %v2346_v63 }
 0x4f3   :  { %v2641_v60 = vpop.eup %2640 }
 0x4f4   :  { %v546_v61 = vmul.f32 %v2641_v60, %v2639_v58  ;;  %v545_v62 = vmul.f32 %v2641_v60, %v543_v59  ;;  %v2643_v9 = vpop.eup %2642 }
 0x4f5   :  { %v539_v11 = vadd.f32 1.0, %v2643_v9 }
 0x4f6   :  { %548 = vrot.lane.b32.xlu0 %v546_v61, %s2918_s3  ;;  %v3231_v61 = vadd.f32 %v3145_v7, %v3109_v45 }
 0x4f7   :  { %2644 = vrcp.f32 %v539_v11 }
 0x504   :  { %v2645_v17 = vpop.eup %2644 }
 0x568   :  { %v549_v13 = vpop.permute.xlu0 %548 }
 0x569   :  { %v551_v15 = vadd.f32 %v549_v13, %v545_v62 }
 0x56b   :  { %2646 = vtanh.f32 %v551_v15  ;;  %v653_v42 = vrot.slane %v551_v15, 6 }
 0x578   :  { %v2647_v19 = vpop.eup %2646 }
 0x579   :  { %v3175_v21 = vmul.f32 %v2647_v19, %v2645_v17 }
 0x57b   :  { %v555_v23 = vrot.slane %v3175_v21, 4 }
 0x57d   :  { %556 = vrot.lane.b32.xlu1 %v555_v23, %s2918_s3 }
 0x5ef   :  { %v557_v25 = vpop.permute.xlu1 %556 }
 0x5f0   :  { %2347 = vmatmul.mubr.msk.f32.vlgmr.msra.gmra.mxu0 %vm137_vm0, %v557_v25 }
 0x5f1   :  { %790 = vmatpush1.msra.mxu0 %v3017_v4  ;;  %837 = vmatprep.mubr.f32.mxu0 %v2917_v0 }
 0x5f2   :  { %791 = vmatprep.subr.mxu0 %v3019_v6 }
 0x5f3   :  { %792 = vmatpush1.msra.mxu0 %v3022_v8 }
 0x5f4   :  { %793 = vmatprep.subr.mxu0 %v3025_v10 }
 0x5f5   :  { %794 = vmatpush1.msra.mxu0 %v3027_v12 }
 0x5f6   :  { %795 = vmatprep.subr.mxu0 %v3030_v14 }
 0x5f7   :  { %796 = vmatpush1.msra.mxu0 %v3033_v16 }
 0x5f8   :  { %797 = vmatprep.subr.mxu0 %v3036_v18 }
 0x5f9   :  { %798 = vmatpush1.msra.mxu0 %v3039_v20 }
 0x5fa   :  { %799 = vmatprep.subr.mxu0 %v3042_v22 }
 0x5fb   :  { %800 = vmatpush1.msra.mxu0 %v3045_v24 }
 0x5fc   :  { %801 = vmatprep.subr.mxu0 %v3048_v26 }
 0x5fd   :  { %802 = vmatpush1.msra.mxu0 %v3051_v28 }
 0x5fe   :  { %803 = vmatprep.subr.mxu0 %v3054_v30 }
 0x5ff   :  { %804 = vmatpush1.msra.mxu0 %v3057_v32 }
 0x600   :  { %1009 = vmatprep.subr.mxu0 %v3014_v2 }
 0x6b0   :  { %v626_v27 = vpop.f32.mrf.mxu0 }
 0x6b1   :  { %v633_v29 = vrot.slane %v626_v27, 2 }
 0x6b2   :  { %v628_v34 = vpop.f32.mrf.mxu0 }
 0x6b3   :  { %v637_v31 = vadd.f32 %v633_v29, %v3106_v40  ;;  %v634_v35 = vrot.slane %v628_v34, 2 }
 0x6b5   :  { %v2348_v33 = vmul.f32 -1.442695, %v637_v31  ;;  %v638_v36 = vadd.f32 %v634_v35, %v3112_v47 }
 0x6b7   :  { %2648 = vpow2.f32 %v2348_v33  ;;  %v2349_v2 = vmul.f32 -1.442695, %v638_v36 }
 0x6b8   :  { %2650 = vtanh.f32 %v638_v36 }
 0x6c4   :  { %v2649_v37 = vpop.eup %2648 }
 0x6c5   :  { %v642_v39 = vadd.f32 1.0, %v2649_v37  ;;  %v2651_v41 = vpop.eup %2650 }
 0x6c7   :  { %2652 = vrcp.f32 %v642_v39 }
 0x6c8   :  { %2654 = vpow2.f32 %v2349_v2 }
 0x6d4   :  { %v2653_v43 = vpop.eup %2652 }
 0x6d5   :  { %v656_v46 = vmul.f32 %v2653_v43, %v2651_v41  ;;  %v655_v48 = vmul.f32 %v2653_v43, %v653_v42  ;;  %v2655_v40 = vpop.eup %2654 }
 0x6d6   :  { %v649_v49 = vadd.f32 1.0, %v2655_v40 }
 0x6d7   :  { %658 = vrot.lane.b32.xlu0 %v656_v46, %s2918_s3 }
 0x6d8   :  { %2656 = vrcp.f32 %v649_v49 }
 0x6e5   :  { %v2657_v47 = vpop.eup %2656 }
 0x749   :  { %v659_v50 = vpop.permute.xlu0 %658 }
 0x74a   :  { %v661_v51 = vadd.f32 %v659_v50, %v655_v48 }
 0x74c   :  { %2658 = vtanh.f32 %v661_v51  ;;  %v757_v13 = vrot.slane %v661_v51, 6 }
 0x759   :  { %v2659_v52 = vpop.eup %2658 }
 0x75a   :  { %v3200_v53 = vmul.f32 %v2659_v52, %v2657_v47 }
 0x75c   :  { %v665_v54 = vrot.slane %v3200_v53, 6 }
 0x75e   :  { %666 = vrot.lane.b32.xlu1 %v665_v54, %s2918_s3 }
 0x7d0   :  { %v3204_v55 = vpop.permute.xlu1 %666 }
 0x7d1   :  { %2350 = vmatmul.mubr.msk.f32.vlgmr.msra.gmra.mxu1 %vm137_vm0, %v3204_v55 }
 0x7d2   :  { %900 = vmatpush1.msra.mxu1 %v3017_v4  ;;  %947 = vmatprep.mubr.f32.mxu1 %v2917_v0 }
 0x7d3   :  { %901 = vmatprep.subr.mxu1 %v3019_v6 }
 0x7d4   :  { %902 = vmatpush1.msra.mxu1 %v3022_v8 }
 0x7d5   :  { %903 = vmatprep.subr.mxu1 %v3025_v10 }
 0x7d6   :  { %904 = vmatpush1.msra.mxu1 %v3027_v12 }
 0x7d7   :  { %905 = vmatprep.subr.mxu1 %v3030_v14 }
 0x7d8   :  { %906 = vmatpush1.msra.mxu1 %v3033_v16 }
 0x7d9   :  { %907 = vmatprep.subr.mxu1 %v3036_v18 }
 0x7da   :  { %908 = vmatpush1.msra.mxu1 %v3039_v20 }
 0x7db   :  { %909 = vmatprep.subr.mxu1 %v3042_v22 }
 0x7dc   :  { %910 = vmatpush1.msra.mxu1 %v3045_v24 }
 0x7dd   :  { %911 = vmatprep.subr.mxu1 %v3048_v26 }
 0x7de   :  { %912 = vmatpush1.msra.mxu1 %v3051_v28 }
 0x7df   :  { %913 = vmatprep.subr.mxu1 %v3054_v30 }
 0x7e0   :  { %914 = vmatpush1.msra.mxu1 %v3057_v32 }
 0x891   :  { %v736_v57 = vpop.f32.mrf.mxu1 }
 0x892   :  { %v741_v58 = vadd.f32 %v736_v57, %v3226_v56 }
 0x893   :  { %v738_v60 = vpop.f32.mrf.mxu1 }
 0x894   :  { %v2351_v59 = vmul.f32 -1.442695, %v741_v58  ;;  %v742_v62 = vadd.f32 %v738_v60, %v3231_v61 }
 0x896   :  { %2660 = vpow2.f32 %v2351_v59  ;;  %v2352_v17 = vmul.f32 -1.442695, %v742_v62 }
 0x897   :  { %2662 = vtanh.f32 %v742_v62 }
 0x8a3   :  { %v2661_v63 = vpop.eup %2660 }
 0x8a4   :  { %v746_v9 = vadd.f32 1.0, %v2661_v63  ;;  %v2663_v11 = vpop.eup %2662 }
 0x8a6   :  { %2664 = vrcp.f32 %v746_v9 }
 0x8a7   :  { %2666 = vpow2.f32 %v2352_v17 }
 0x8b3   :  { %v2665_v38 = vpop.eup %2664 }
 0x8b4   :  { %v760_v5 = vmul.f32 %v2665_v38, %v2663_v11  ;;  %v759_v15 = vmul.f32 %v2665_v38, %v757_v13  ;;  %v2667_v19 = vpop.eup %2666 }
 0x8b5   :  { %v753_v23 = vadd.f32 1.0, %v2667_v19 }
 0x8b6   :  { %762 = vrot.lane.b32.xlu0 %v760_v5, %s2918_s3 }
 0x8b7   :  { %2668 = vrcp.f32 %v753_v23 }
 0x8c4   :  { %v2669_v7 = vpop.eup %2668 }
 0x928   :  { %v763_v25 = vpop.permute.xlu0 %762 }
 0x929   :  { %v765_v45 = vadd.f32 %v763_v25, %v759_v15  ;;  %v1135_v25 = vrot.slane %v3175_v21, 2 }
 0x92b   :  { %2670 = vtanh.f32 %v765_v45 }
 0x938   :  { %v2671_v27 = vpop.eup %2670 }
 0x939   :  { %v3235_v29 = vmul.f32 %v2671_v27, %v2669_v7  ;;  %v1143_v7 = vrot.slane %v3150_v44, 6 }
 0x93b   :  { %769 = vrot.lane.b32.xlu1 %v3235_v29, %s2918_s3 }
 0x9ad   :  { %v3239_v31 = vpop.permute.xlu1 %769 }
 0x9ae   :  { %2353 = vmatmul.mubr.msk.f32.vlgmr.msra.gmra.mxu0 %vm137_vm0, %v3239_v31 }
 0x9af   :  { %1010 = vmatpush1.msra.mxu0 %v3017_v4  ;;  %1057 = vmatprep.mubr.f32.mxu0 %v2917_v0 }
 0x9b0   :  { %1011 = vmatprep.subr.mxu0 %v3019_v6 }
 0x9b1   :  { %1012 = vmatpush1.msra.mxu0 %v3022_v8 }
 0x9b2   :  { %1013 = vmatprep.subr.mxu0 %v3025_v10 }
 0x9b3   :  { %1014 = vmatpush1.msra.mxu0 %v3027_v12 }
 0x9b4   :  { %1015 = vmatprep.subr.mxu0 %v3030_v14 }
 0x9b5   :  { %1016 = vmatpush1.msra.mxu0 %v3033_v16 }
 0x9b6   :  { %1017 = vmatprep.subr.mxu0 %v3036_v18 }
 0x9b7   :  { %1018 = vmatpush1.msra.mxu0 %v3039_v20 }
 0x9b8   :  { %1019 = vmatprep.subr.mxu0 %v3042_v22 }
 0x9b9   :  { %1020 = vmatpush1.msra.mxu0 %v3045_v24  ;;  %v866_v24 = vrot.slane %v765_v45, 6  ;;  %v1124_v45 = vrot.slane %v3235_v29, 2 }
 0x9ba   :  { %1021 = vmatprep.subr.mxu0 %v3048_v26 }
 0x9bb   :  { %1022 = vmatpush1.msra.mxu0 %v3051_v28 }
 0x9bc   :  { %1023 = vmatprep.subr.mxu0 %v3054_v30 }
 0x9bd   :  { %1024 = vmatpush1.msra.mxu0 %v3057_v32 }
 0x9be   :  { %2472 = vmatprep.subr.mxu0 %v2917_v0 }
 0xa6e   :  { %v839_v4 = vpop.f32.mrf.mxu0 }
 0xa6f   :  { %v846_v6 = vrot.slane %v839_v4, 6 }
 0xa70   :  { %v841_v12 = vpop.f32.mrf.mxu0 }
 0xa71   :  { %v850_v8 = vadd.f32 %v846_v6, %v3226_v56  ;;  %v847_v14 = vrot.slane %v841_v12, 6 }
 0xa73   :  { %v2354_v10 = vmul.f32 -1.442695, %v850_v8  ;;  %v851_v16 = vadd.f32 %v847_v14, %v3231_v61 }
 0xa75   :  { %2672 = vpow2.f32 %v2354_v10  ;;  %v2355_v32 = vmul.f32 -1.442695, %v851_v16 }
 0xa76   :  { %2674 = vtanh.f32 %v851_v16 }
 0xa82   :  { %v2673_v18 = vpop.eup %2672 }
 0xa83   :  { %v855_v20 = vadd.f32 1.0, %v2673_v18  ;;  %v2675_v22 = vpop.eup %2674 }
 0xa85   :  { %2676 = vrcp.f32 %v855_v20 }
 0xa86   :  { %2678 = vpow2.f32 %v2355_v32 }
 0xa92   :  { %v2677_v26 = vpop.eup %2676 }
 0xa93   :  { %v869_v28 = vmul.f32 %v2677_v26, %v2675_v22  ;;  %v868_v30 = vmul.f32 %v2677_v26, %v866_v24  ;;  %v2679_v33 = vpop.eup %2678 }
 0xa94   :  { %v862_v34 = vadd.f32 1.0, %v2679_v33 }
 0xa95   :  { %871 = vrot.lane.b32.xlu0 %v869_v28, %s2918_s3 }
 0xa96   :  { %2680 = vrcp.f32 %v862_v34 }
 0xaa3   :  { %v2681_v37 = vpop.eup %2680 }
 0xb07   :  { %v872_v35 = vpop.permute.xlu0 %871 }
 0xb08   :  { %v874_v36 = vadd.f32 %v872_v35, %v868_v30 }
 0xb0a   :  { %2682 = vtanh.f32 %v874_v36  ;;  %v976_v57 = vrot.slane %v874_v36, 6  ;;  %v1168_v36 = vld [vmem:[%s3545_s4 + $0x18] sm:$0xff] }
 0xb17   :  { %v2683_v39 = vpop.eup %2682 }
 0xb18   :  { %v3263_v41 = vmul.f32 %v2683_v39, %v2681_v37  ;;  %v3312_v37 = vld [vmem:[#allocation8 + $0x18] sm:$0xff] }
 0xb19   :  { %v1166_v39 = vld [vmem:[%s3545_s4 + $0x8] sm:$0xff] }
 0xb1a   :  { %v878_v42 = vrot.slane %v3263_v41, 2  ;;  %v1116_v23 = vrot.slane %v3263_v41, 6 }
 0xb1c   :  { %879 = vrot.lane.b32.xlu1 %v878_v42, %s2918_s3  ;;  %v1165_v42 = vld [vmem:[%s3545_s4] sm:$0xff] }
 0xb8e   :  { %v880_v43 = vpop.permute.xlu1 %879 }
 0xb8f   :  { %2356 = vmatmul.mubr.msk.f32.vlgmr.msra.gmra.mxu1 %vm137_vm0, %v880_v43  ;;  %v3326_v43 = vld [vmem:[#allocation8 + $0x8] sm:$0xff] }
 0xc4f   :  { %v949_v46 = vpop.f32.mrf.mxu1 }
 0xc50   :  { %v956_v48 = vrot.slane %v949_v46, 4  ;;  %v3329_v46 = vld [vmem:[#allocation8] sm:$0xff] }
 0xc51   :  { %v951_v49 = vpop.f32.mrf.mxu1 }
 0xc52   :  { %v960_v2 = vadd.f32 %v956_v48, %v3226_v56  ;;  %v957_v50 = vrot.slane %v951_v49, 4 }
 0xc54   :  { %v2357_v40 = vmul.f32 -1.442695, %v960_v2  ;;  %v961_v51 = vadd.f32 %v957_v50, %v3231_v61  ;;  %v1151_v50 = vrot.slane %v3118_v1, 2 }
 0xc56   :  { %2684 = vpow2.f32 %v2357_v40  ;;  %v2358_v62 = vmul.f32 -1.442695, %v961_v51 }
 0xc57   :  { %2686 = vtanh.f32 %v961_v51 }
 0xc63   :  { %v2685_v47 = vpop.eup %2684 }
 0xc64   :  { %v965_v52 = vadd.f32 1.0, %v2685_v47  ;;  %v2687_v54 = vpop.eup %2686 }
 0xc66   :  { %2688 = vrcp.f32 %v965_v52 }
 0xc67   :  { %2690 = vpow2.f32 %v2358_v62 }
 0xc73   :  { %v2689_v58 = vpop.eup %2688 }
 0xc74   :  { %v979_v59 = vmul.f32 %v2689_v58, %v2687_v54  ;;  %v978_v60 = vmul.f32 %v2689_v58, %v976_v57  ;;  %v2691_v63 = vpop.eup %2690 }
 0xc75   :  { %v972_v9 = vadd.f32 1.0, %v2691_v63 }
 0xc76   :  { %981 = vrot.lane.b32.xlu0 %v979_v59, %s2918_s3 }
 0xc77   :  { %2692 = vrcp.f32 %v972_v9 }
 0xc84   :  { %v2693_v38 = vpop.eup %2692 }
 0xce8   :  { %v982_v11 = vpop.permute.xlu0 %981 }
 0xce9   :  { %v984_v13 = vadd.f32 %v982_v11, %v978_v60 }
 0xceb   :  { %2694 = vtanh.f32 %v984_v13  ;;  %v1086_v22 = vrot.slane %v984_v13, 6 }
 0xcf8   :  { %v2695_v5 = vpop.eup %2694 }
 0xcf9   :  { %v986_v15 = vmul.f32 %v2695_v5, %v2693_v38 }
 0xcfb   :  { %v988_v17 = vrot.slane %v986_v15, 4  ;;  %v1108_v19 = vrot.slane %v986_v15, 2 }
 0xcfd   :  { %989 = vrot.lane.b32.xlu1 %v988_v17, %s2918_s3  ;;  %v1131_v17 = vsel %vm1103_vm2, %v3239_v31, %v3204_v55 }
 0xd01   :  { %1109 = vrot.lane.b32.xlu1 %v1108_v19, %s2918_s3 }
 0xd05   :  { %1117 = vrot.lane.b32.xlu1 %v1116_v23, %s2918_s3 }
 0xd09   :  { %1136 = vrot.lane.b32.xlu1 %v1135_v25, %s2918_s3 }
 0xd0d   :  { %1125 = vrot.lane.b32.xlu1 %v1124_v45, %s2918_s3 }
 0xd11   :  { %1144 = vrot.lane.b32.xlu1 %v1143_v7, %s2918_s3 }
 0xd6f   :  { %v990_v27 = vpop.permute.xlu1 %989 }
 0xd70   :  { %2359 = vmatmul.mubr.msk.f32.vlgmr.msra.gmra.mxu0 %vm137_vm0, %v990_v27 }
 0xd71   :  { %2473 = vmatpush3.msra.mxu0 %v3312_v37  ;;  %2480 = vmatprep.mubr.msk.f32.mxu0 %vm2919_vm1, %v2917_v0 }
 0xd72   :  { %2474 = vmatprep.subr.mxu0 %v2917_v0 }
 0xd73   :  { %v1110_v51 = vpop.permute.xlu1 %1109 }
 0xd77   :  { %v1118_v52 = vpop.permute.xlu1 %1117 }
 0xd7b   :  { %v1137_v57 = vpop.permute.xlu1 %1136 }
 0xd7f   :  { %v1126_v59 = vpop.permute.xlu1 %1125 }
 0xd83   :  { %v1145_v62 = vpop.permute.xlu1 %1144 }
 0xe30   :  { %v1059_v4 = vpop.f32.mrf.mxu0 }
 0xe31   :  { %v1066_v6 = vrot.slane %v1059_v4, 2 }
 0xe32   :  { %v1061_v12 = vpop.f32.mrf.mxu0 }
 0xe33   :  { %v1070_v8 = vadd.f32 %v1066_v6, %v3226_v56  ;;  %v1067_v14 = vrot.slane %v1061_v12, 2  ;;  %v1172_v56 = vld [vmem:[%s3545_s4 + $0x38] sm:$0xff] }
 0xe34   :  { %2453 = vmatprep.subr.mxu1 %v1172_v56 }
 0xe35   :  { %v2360_v10 = vmul.f32 -1.442695, %v1070_v8  ;;  %v1071_v16 = vadd.f32 %v1067_v14, %v3231_v61  ;;  %v1171_v61 = vld [vmem:[%s3545_s4 + $0x30] sm:$0xff]  ;;  %2454 = vmatpush3.msra.mxu1 %v1172_v56  ;;  %v2362_v8 = vld [vmem:[%s3547_s6] ss:$0 sm:$0xff]  ;;  %s2920_s6 = smov 32  }
 0xe36   :  { %2455 = vmatprep.subr.mxu1 %v1171_v61 }
 0xe37   :  { %2696 = vpow2.f32 %v2360_v10  ;;  %2456 = vmatpush3.msra.mxu1 %v1171_v61  ;;  %v2361_v30 = vmul.f32 -1.442695, %v1071_v16 }
 0xe38   :  { %2698 = vtanh.f32 %v1071_v16 }
 0xe44   :  { %v2697_v29 = vpop.eup %2696 }
 0xe45   :  { %v1075_v18 = vadd.f32 1.0, %v2697_v29  ;;  %v2699_v20 = vpop.eup %2698 }
 0xe47   :  { %2700 = vrcp.f32 %v1075_v18 }
 0xe48   :  { %2702 = vpow2.f32 %v2361_v30 }
 0xe54   :  { %v2701_v24 = vpop.eup %2700 }
 0xe55   :  { %v1089_v26 = vmul.f32 %v2701_v24, %v2699_v20  ;;  %v1088_v28 = vmul.f32 %v2701_v24, %v1086_v22  ;;  %v2703_v32 = vpop.eup %2702 }
 0xe56   :  { %v1082_v33 = vadd.f32 1.0, %v2703_v32 }
 0xe57   :  { %1091 = vrot.lane.b32.xlu0 %v1089_v26, %s2918_s3 }
 0xe58   :  { %2704 = vrcp.f32 %v1082_v33 }
 0xe5b   :  { %1105 = vrot.lane.b32.xlu0 %v3150_v44, %s2918_s3  ;;  %v1170_v44 = vld [vmem:[%s3545_s4 + $0x28] sm:$0xff] }
 0xe5c   :  { %2457 = vmatprep.subr.mxu1 %v1170_v44 }
 0xe5d   :  { %2458 = vmatpush3.msra.mxu1 %v1170_v44 }
 0xe5f   :  { %1113 = vrot.lane.b32.xlu0 %v3175_v21, %s2918_s3  ;;  %v1169_v21 = vld [vmem:[%s3545_s4 + $0x20] sm:$0xff] }
 0xe60   :  { %2459 = vmatprep.subr.mxu1 %v1169_v21 }
 0xe61   :  { %2460 = vmatpush3.msra.mxu1 %v1169_v21 }
 0xe62   :  { %2461 = vmatprep.subr.mxu1 %v1168_v36 }
 0xe63   :  { %1132 = vrot.lane.b32.xlu0 %v3263_v41, %s2918_s3  ;;  %2462 = vmatpush3.msra.mxu1 %v1168_v36  ;;  %v3317_v41 = vld [vmem:[#allocation8 + $0x10] sm:$0xff] }
 0xe64   :  { %2475 = vmatpush3.msra.mxu0 %v3317_v41 }
 0xe65   :  { %2476 = vmatprep.subr.mxu0 %v2917_v0  ;;  %v2705_v48 = vpop.eup %2704 }
 0xe66   :  { %2477 = vmatpush3.msra.mxu0 %v3326_v43 }
 0xe67   :  { %1121 = vrot.lane.b32.xlu0 %v3200_v53, %s2918_s3  ;;  %v1167_v53 = vld [vmem:[%s3545_s4 + $0x10] sm:$0xff]  ;;  %2478 = vmatprep.subr.mxu0 %v2917_v0 }
 0xe68   :  { %2463 = vmatprep.subr.mxu1 %v1167_v53  ;;  %2479 = vmatpush3.msra.mxu0 %v3329_v46 }
 0xe69   :  { %2464 = vmatpush3.msra.mxu1 %v1167_v53  ;;  %2481 = vmatmul.mubr.f32.vlgmr.msra.gmra.mxu0 %v2917_v0 }
 0xe6a   :  { %2465 = vmatprep.subr.mxu1 %v1166_v39  ;;  %2494 = vmatprep.subr.mxu0 %v2917_v0 }
 0xe6b   :  { %1140 = vrot.lane.b32.xlu0 %v986_v15, %s2918_s3  ;;  %2466 = vmatpush3.msra.mxu1 %v1166_v39 }
 0xe6c   :  { %2467 = vmatprep.subr.mxu1 %v1165_v42  ;;  %2495 = vmatpush3.msra.mxu0 %v3312_v37 }
 0xe6d   :  { %2468 = vmatpush3.msra.mxu1 %v1165_v42  ;;  %2502 = vmatprep.mubr.msk.f32.mxu0 %vm2919_vm1, %v2917_v0 }
 0xe6e   :  { %2483 = vmatprep.subr.mxu1 %v2917_v0  ;;  %2496 = vmatprep.subr.mxu0 %v2917_v0 }
 0xe6f   :  { %2497 = vmatpush3.msra.mxu0 %v3317_v41 }
 0xe70   :  { %2498 = vmatprep.subr.mxu0 %v2917_v0 }
 0xe71   :  { %2499 = vmatpush3.msra.mxu0 %v3326_v43 }
 0xe72   :  { %2500 = vmatprep.subr.mxu0 %v2917_v0 }
 0xe73   :  { %2501 = vmatpush3.msra.mxu0 %v3329_v46 }
 0xe74   :  { %2516 = vmatprep.subr.mxu0 %v2917_v0 }
 0xec9   :  { %v1092_v34 = vpop.permute.xlu0 %1091 }
 0xeca   :  { %v1094_v35 = vadd.f32 %v1092_v34, %v1088_v28 }
 0xecc   :  { %2706 = vtanh.f32 %v1094_v35 }
 0xecd   :  { %v1106_v47 = vpop.permute.xlu0 %1105 }
 0xece   :  { %v1112_v9 = vsel %vm1103_vm2, %v1106_v47, %v1110_v51 }
 0xed1   :  { %v1114_v54 = vpop.permute.xlu0 %1113 }
 0xed2   :  { %v1120_v38 = vsel %vm1103_vm2, %v1114_v54, %v1118_v52 }
 0xed5   :  { %v1133_v58 = vpop.permute.xlu0 %1132 }
 0xed6   :  { %v1139_v11 = vsel %vm1103_vm2, %v1133_v58, %v1137_v57 }
 0xed7   :  { %v1162_v25 = vsel %vm1156_vm3, %v1131_v17, %v1139_v11 }
 0xed9   :  { %v2707_v2 = vpop.eup %2706  ;;  %v1122_v60 = vpop.permute.xlu0 %1121 }
 0xeda   :  { %v1096_v40 = vmul.f32 %v2707_v2, %v2705_v48  ;;  %v1128_v19 = vsel %vm1103_vm2, %v1122_v60, %v1126_v59 }
 0xedc   :  { %1148 = vrot.lane.b32.xlu0 %v1096_v40, %s2918_s3  ;;  %v1099_v49 = vrot.slane %v1096_v40, 6 }
 0xedd   :  { %v1141_v63 = vpop.permute.xlu0 %1140 }
 0xede   :  { %1100 = vrot.lane.b32.xlu1 %v1099_v49, %s2918_s3  ;;  %v1147_v5 = vsel %vm1103_vm2, %v1141_v63, %v1145_v62 }
 0xedf   :  { %v1163_v4 = vsel %vm1158_vm5, %v1162_v25, %v1147_v5 }
 0xee2   :  { %1152 = vrot.lane.b32.xlu1 %v1151_v50, %s2918_s3 }
 0xf29   :  { %v1333_v55 = vpop.f32.mrf.mxu0 }
 0xf2b   :  { %v2482_v31 = vpop.f32.mrf.mxu0 }
 0xf4e   :  { %v1149_v45 = vpop.permute.xlu0 %1148 }
 0xf50   :  { %v1101_v1 = vpop.permute.xlu1 %1100 }
 0xf51   :  { %v1104_v13 = vsel %vm1103_vm2, %v3122_v3, %v1101_v1 }
 0xf52   :  { %v1157_v15 = vsel %vm1156_vm3, %v1104_v13, %v1112_v9 }
 0xf53   :  { %v1159_v23 = vsel %vm1158_vm5, %v1157_v15, %v1120_v38 }
 0xf54   :  { %v1153_v7 = vpop.permute.xlu1 %1152  ;;  %v1161_v27 = vsel %vm1160_vm4, %v1159_v23, %v1128_v19 }
 0xf55   :  { %v3363_v3 = vsel %vm1103_vm2, %v1149_v45, %v1153_v7  ;;  %2469 = vmatprep.mubr.msk.f32.mxu1 %vm137_vm0, %v1161_v27 }
 0xf56   :  { %v1164_v6 = vsel %vm1160_vm4, %v1163_v4, %v3363_v3 }
 0xf57   :  { %2470 = vmatmul.mubr.msk.f32.vlgmr.msra.gmra.mxu1 %vm137_vm0, %v1164_v6 }
 0xf58   :  { %2484 = vmatpush3.msra.mxu1 %v3312_v37  ;;  %2491 = vmatprep.mubr.msk.f32.mxu1 %vm2919_vm1, %v2917_v0 }
 0xf59   :  { %2485 = vmatprep.subr.mxu1 %v2917_v0 }
 0xf5a   :  { %2486 = vmatpush3.msra.mxu1 %v3317_v41 }
 0xf5b   :  { %2487 = vmatprep.subr.mxu1 %v2917_v0 }
 0xf5c   :  { %2488 = vmatpush3.msra.mxu1 %v3326_v43 }
 0xf5d   :  { %2489 = vmatprep.subr.mxu1 %v2917_v0 }
 0xf5e   :  { %2490 = vmatpush3.msra.mxu1 %v3329_v46 }
 0xf5f   :  { %2505 = vmatprep.subr.mxu1 %v2917_v0 }
0x1017   :  { %v2471_v10 = vpop.f32.mrf.mxu1 }
0x1018   :  { %v3381_v12 = vadd.f32 %v2471_v10, %v2362_v8 }
0x1019   :  { %v1252_v14 = vpop.f32.mrf.mxu1 }
0x101a   :  { %v3383_v16 = vadd.f32 %v2362_v8, %v1252_v14 }
0x101c   :  { %v1337_v29 = vadd.f32 %v1333_v55, %v3383_v16 }
0x101e   :  { %2708 = vtanh.f32 %v1337_v29  ;;  %v2365_v20 = vmul.f32 -1.442695, %v1337_v29 }
0x1020   :  { %2710 = vpow2.f32 %v2365_v20 }
0x102b   :  { %v2709_v18 = vpop.eup %2708 }
0x102c   :  { %1347 = vrot.lane.b32.xlu0 %v2709_v18, %s2918_s3 }
0x102d   :  { %v2711_v22 = vpop.eup %2710 }
0x102e   :  { %v1341_v24 = vadd.f32 1.0, %v2711_v22 }
0x1030   :  { %2712 = vrcp.f32 %v1341_v24 }
0x103d   :  { %v2713_v26 = vpop.eup %2712 }
0x103e   :  { %v1345_v61 = vmul.f32 0.0, %v2713_v26 }
0x109e   :  { %v1348_v28 = vpop.permute.xlu0 %1347 }
0x109f   :  { %v1350_v56 = vmul.f32 %v2713_v26, %v1348_v28 }
0x10a1   :  { %1352 = vrot.lane.b32.xlu1 %v1350_v56, %s2920_s6 }
0x1113   :  { %v1353_v44 = vpop.permute.xlu1 %1352 }
0x1114   :  { %v1355_v21 = vadd.f32 %v1353_v44, %v1345_v61 }
0x1116   :  { %2714 = vtanh.f32 %v1355_v21  ;;  %v1449_v47 = vrot.slane %v1355_v21, 6 }
0x1123   :  { %v2715_v30 = vpop.eup %2714 }
0x1124   :  { %1358 = vrot.lane.b32.xlu0 %v2715_v30, %s2918_s3 }
0x1196   :  { %v1359_v32 = vpop.permute.xlu0 %1358 }
0x1197   :  { %v1361_v33 = vmul.f32 %v2713_v26, %v1359_v32 }
0x1199   :  { %1363 = vrot.lane.b32.xlu1 %v1361_v33, %s2920_s6 }
0x120b   :  { %v1364_v34 = vpop.permute.xlu1 %1363 }
0x120c   :  { %2492 = vmatmul.mubr.msk.f32.vlgmr.msra.gmra.mxu1 %vm1103_vm2, %v1364_v34 }
0x120d   :  { %2506 = vmatpush3.msra.mxu1 %v3312_v37  ;;  %2513 = vmatprep.mubr.msk.f32.mxu1 %vm2919_vm1, %v2917_v0 }
0x120e   :  { %2507 = vmatprep.subr.mxu1 %v2917_v0 }
0x120f   :  { %2508 = vmatpush3.msra.mxu1 %v3317_v41 }
0x1210   :  { %2509 = vmatprep.subr.mxu1 %v2917_v0 }
0x1211   :  { %2510 = vmatpush3.msra.mxu1 %v3326_v43 }
0x1212   :  { %2511 = vmatprep.subr.mxu1 %v2917_v0 }
0x1213   :  { %2512 = vmatpush3.msra.mxu1 %v3329_v46 }
0x1214   :  { %2527 = vmatprep.subr.mxu1 %v2917_v0 }
0x12cc   :  { %v1433_v35 = vpop.f32.mrf.mxu1 }
0x12cd   :  { %v1438_v36 = vrot.slane %v1433_v35, 6 }
0x12ce   :  { %v2493_v53 = vpop.f32.mrf.mxu1 }
0x12cf   :  { %v1440_v39 = vadd.f32 %v1438_v36, %v3383_v16 }
0x12d1   :  { %2716 = vtanh.f32 %v1440_v39  ;;  %v2367_v48 = vmul.f32 -1.442695, %v1440_v39 }
0x12d3   :  { %2718 = vpow2.f32 %v2367_v48 }
0x12de   :  { %v2717_v42 = vpop.eup %2716 }
0x12df   :  { %1453 = vrot.lane.b32.xlu0 %v2717_v42, %s2918_s3 }
0x12e0   :  { %v2719_v2 = vpop.eup %2718 }
0x12e1   :  { %v1444_v40 = vadd.f32 1.0, %v2719_v2 }
0x12e3   :  { %2720 = vrcp.f32 %v1444_v40 }
0x12f0   :  { %v2721_v49 = vpop.eup %2720 }
0x12f1   :  { %v1451_v52 = vmul.f32 %v2721_v49, %v1449_v47 }
0x1351   :  { %v1454_v50 = vpop.permute.xlu0 %1453 }
0x1352   :  { %v1456_v51 = vmul.f32 %v2721_v49, %v1454_v50 }
0x1354   :  { %1458 = vrot.lane.b32.xlu1 %v1456_v51, %s2920_s6 }
0x13c6   :  { %v1459_v54 = vpop.permute.xlu1 %1458 }
0x13c7   :  { %v1461_v57 = vadd.f32 %v1459_v54, %v1451_v52 }
0x13c9   :  { %2722 = vtanh.f32 %v1461_v57  ;;  %v1556_v45 = vrot.slane %v1461_v57, 6 }
0x13d6   :  { %v2723_v58 = vpop.eup %2722 }
0x13d7   :  { %1464 = vrot.lane.b32.xlu0 %v2723_v58, %s2918_s3 }
0x1449   :  { %v1465_v59 = vpop.permute.xlu0 %1464 }
0x144a   :  { %v1467_v60 = vmul.f32 %v2721_v49, %v1465_v59 }
0x144c   :  { %v1469_v62 = vrot.slane %v1467_v60, 2 }
0x144e   :  { %1470 = vrot.lane.b32.xlu1 %v1469_v62, %s2920_s6 }
0x14c0   :  { %v1471_v63 = vpop.permute.xlu1 %1470 }
0x14c1   :  { %2503 = vmatmul.mubr.msk.f32.vlgmr.msra.gmra.mxu0 %vm1103_vm2, %v1471_v63 }
0x14c2   :  { %2517 = vmatpush3.msra.mxu0 %v3312_v37  ;;  %2524 = vmatprep.mubr.msk.f32.mxu0 %vm2919_vm1, %v2917_v0 }
0x14c3   :  { %2518 = vmatprep.subr.mxu0 %v2917_v0 }
0x14c4   :  { %2519 = vmatpush3.msra.mxu0 %v3317_v41 }
0x14c5   :  { %2520 = vmatprep.subr.mxu0 %v2917_v0 }
0x14c6   :  { %2521 = vmatpush3.msra.mxu0 %v3326_v43 }
0x14c7   :  { %2522 = vmatprep.subr.mxu0 %v2917_v0 }
0x14c8   :  { %2523 = vmatpush3.msra.mxu0 %v3329_v46 }
0x14c9   :  { %2538 = vmatprep.subr.mxu0 %v2917_v0 }
0x1581   :  { %v1540_v1 = vpop.f32.mrf.mxu0 }
0x1582   :  { %v1545_v9 = vrot.slane %v1540_v1, 4 }
0x1583   :  { %v2504_v11 = vpop.f32.mrf.mxu0 }
0x1584   :  { %v1547_v13 = vadd.f32 %v1545_v9, %v3383_v16 }
0x1586   :  { %2724 = vtanh.f32 %v1547_v13  ;;  %v2369_v5 = vmul.f32 -1.442695, %v1547_v13 }
0x1588   :  { %2726 = vpow2.f32 %v2369_v5 }
0x1593   :  { %v2725_v38 = vpop.eup %2724 }
0x1594   :  { %1560 = vrot.lane.b32.xlu0 %v2725_v38, %s2918_s3 }
0x1595   :  { %v2727_v15 = vpop.eup %2726 }
0x1596   :  { %v1551_v17 = vadd.f32 1.0, %v2727_v15 }
0x1598   :  { %2728 = vrcp.f32 %v1551_v17 }
0x15a5   :  { %v2729_v19 = vpop.eup %2728 }
0x15a6   :  { %v1558_v7 = vmul.f32 %v2729_v19, %v1556_v45 }
0x1606   :  { %v1561_v23 = vpop.permute.xlu0 %1560 }
0x1607   :  { %v1563_v25 = vmul.f32 %v2729_v19, %v1561_v23 }
0x1609   :  { %1565 = vrot.lane.b32.xlu1 %v1563_v25, %s2920_s6 }
0x167b   :  { %v1566_v27 = vpop.permute.xlu1 %1565 }
0x167c   :  { %v1568_v4 = vadd.f32 %v1566_v27, %v1558_v7 }
0x167e   :  { %2730 = vtanh.f32 %v1568_v4  ;;  %v1663_v21 = vrot.slane %v1568_v4, 6 }
0x168b   :  { %v2731_v6 = vpop.eup %2730 }
0x168c   :  { %1571 = vrot.lane.b32.xlu0 %v2731_v6, %s2918_s3 }
0x16fe   :  { %v1572_v55 = vpop.permute.xlu0 %1571 }
0x16ff   :  { %v1574_v31 = vmul.f32 %v2729_v19, %v1572_v55  ;;  %v2113_v55 = vld [vmem:[#allocation10 + $0x38] sm:$0xff] }
0x1701   :  { %v1576_v8 = vrot.slane %v1574_v31, 4 }
0x1703   :  { %1577 = vrot.lane.b32.xlu1 %v1576_v8, %s2920_s6  ;;  %v2112_v8 = vld [vmem:[#allocation10 + $0x30] sm:$0xff] }
0x1775   :  { %v1578_v10 = vpop.permute.xlu1 %1577 }
0x1776   :  { %2514 = vmatmul.mubr.msk.f32.vlgmr.msra.gmra.mxu1 %vm1103_vm2, %v1578_v10  ;;  %v2111_v10 = vld [vmem:[#allocation10 + $0x28] sm:$0xff] }
0x1777   :  { %2528 = vmatpush3.msra.mxu1 %v3312_v37  ;;  %2535 = vmatprep.mubr.msk.f32.mxu1 %vm2919_vm1, %v2917_v0 }
0x1778   :  { %2529 = vmatprep.subr.mxu1 %v2917_v0 }
0x1779   :  { %2530 = vmatpush3.msra.mxu1 %v3317_v41 }
0x177a   :  { %2531 = vmatprep.subr.mxu1 %v2917_v0 }
0x177b   :  { %2532 = vmatpush3.msra.mxu1 %v3326_v43 }
0x177c   :  { %2533 = vmatprep.subr.mxu1 %v2917_v0 }
0x177d   :  { %2534 = vmatpush3.msra.mxu1 %v3329_v46 }
0x177e   :  { %2549 = vmatprep.subr.mxu1 %v2917_v0 }
0x1836   :  { %v1647_v14 = vpop.f32.mrf.mxu1 }
0x1837   :  { %v1652_v29 = vrot.slane %v1647_v14, 2  ;;  %v2110_v14 = vld [vmem:[#allocation10 + $0x20] sm:$0xff] }
0x1838   :  { %v2515_v18 = vpop.f32.mrf.mxu1 }
0x1839   :  { %v1654_v20 = vadd.f32 %v1652_v29, %v3383_v16  ;;  %v2109_v29 = vld [vmem:[#allocation10 + $0x18] sm:$0xff]  ;;  %v2108_v18 = vld [vmem:[#allocation10 + $0x10] sm:$0xff] }
0x183b   :  { %2732 = vtanh.f32 %v1654_v20  ;;  %v2371_v24 = vmul.f32 -1.442695, %v1654_v20  ;;  %v2107_v20 = vld [vmem:[#allocation10 + $0x8] sm:$0xff] }
0x183d   :  { %2734 = vpow2.f32 %v2371_v24  ;;  %v2122_v24 = vrot.slane %v3363_v3, 6 }
0x1848   :  { %v2733_v22 = vpop.eup %2732 }
0x1849   :  { %1667 = vrot.lane.b32.xlu0 %v2733_v22, %s2918_s3  ;;  %v2106_v22 = vld [vmem:[#allocation10] sm:$0xff] }
0x184a   :  { %v2735_v26 = vpop.eup %2734 }
0x184b   :  { %v1658_v28 = vadd.f32 1.0, %v2735_v26 }
0x184d   :  { %2736 = vrcp.f32 %v1658_v28 }
0x185a   :  { %v2737_v56 = vpop.eup %2736 }
0x185b   :  { %v1665_v30 = vmul.f32 %v2737_v56, %v1663_v21 }
0x18bb   :  { %v1668_v61 = vpop.permute.xlu0 %1667 }
0x18bc   :  { %v1670_v44 = vmul.f32 %v2737_v56, %v1668_v61 }
0x18be   :  { %1672 = vrot.lane.b32.xlu1 %v1670_v44, %s2920_s6 }
0x1930   :  { %v1673_v32 = vpop.permute.xlu1 %1672 }
0x1931   :  { %v1675_v33 = vadd.f32 %v1673_v32, %v1665_v30 }
0x1933   :  { %2738 = vtanh.f32 %v1675_v33  ;;  %v1767_v54 = vrot.slane %v1675_v33, 6 }
0x1940   :  { %v2739_v16 = vpop.eup %2738 }
0x1941   :  { %1678 = vrot.lane.b32.xlu0 %v2739_v16, %s2918_s3 }
0x19b3   :  { %v1679_v34 = vpop.permute.xlu0 %1678 }
0x19b4   :  { %v1681_v35 = vmul.f32 %v2737_v56, %v1679_v34 }
0x19b6   :  { %v1683_v36 = vrot.slane %v1681_v35, 6 }
0x19b8   :  { %1684 = vrot.lane.b32.xlu1 %v1683_v36, %s2920_s6 }
0x1a2a   :  { %v1685_v53 = vpop.permute.xlu1 %1684 }
0x1a2b   :  { %2525 = vmatmul.mubr.msk.f32.vlgmr.msra.gmra.mxu0 %vm1103_vm2, %v1685_v53 }
0x1a2c   :  { %2539 = vmatpush3.msra.mxu0 %v3312_v37  ;;  %2546 = vmatprep.mubr.msk.f32.mxu0 %vm2919_vm1, %v2917_v0 }
0x1a2d   :  { %2540 = vmatprep.subr.mxu0 %v2917_v0 }
0x1a2e   :  { %2541 = vmatpush3.msra.mxu0 %v3317_v41 }
0x1a2f   :  { %2542 = vmatprep.subr.mxu0 %v2917_v0 }
0x1a30   :  { %2543 = vmatpush3.msra.mxu0 %v3326_v43 }
0x1a31   :  { %2544 = vmatprep.subr.mxu0 %v2917_v0 }
0x1a32   :  { %2545 = vmatpush3.msra.mxu0 %v3329_v46 }
0x1a33   :  { %2560 = vmatprep.subr.mxu0 %v2917_v0 }
0x1aeb   :  { %v1754_v39 = vpop.f32.mrf.mxu0 }
0x1aec   :  { %v1758_v42 = vadd.f32 %v1754_v39, %v3381_v12  ;;  %v2380_v39 = vld [vmem:[%s3549_s8] ss:$0 sm:$0xff] }
0x1aed   :  { %v2526_v48 = vpop.f32.mrf.mxu0 }
0x1aee   :  { %2740 = vtanh.f32 %v1758_v42  ;;  %v2373_v40 = vmul.f32 -1.442695, %v1758_v42 }
0x1af0   :  { %2742 = vpow2.f32 %v2373_v40 }
0x1afb   :  { %v2741_v2 = vpop.eup %2740 }
0x1afc   :  { %1771 = vrot.lane.b32.xlu0 %v2741_v2, %s2918_s3 }
0x1afd   :  { %v2743_v49 = vpop.eup %2742 }
0x1afe   :  { %v1762_v50 = vadd.f32 1.0, %v2743_v49 }
0x1b00   :  { %2744 = vrcp.f32 %v1762_v50 }
0x1b0d   :  { %v2745_v51 = vpop.eup %2744 }
0x1b0e   :  { %v1769_v57 = vmul.f32 %v2745_v51, %v1767_v54 }
0x1b6e   :  { %v1772_v47 = vpop.permute.xlu0 %1771 }
0x1b6f   :  { %v1774_v52 = vmul.f32 %v2745_v51, %v1772_v47 }
0x1b71   :  { %1776 = vrot.lane.b32.xlu1 %v1774_v52, %s2920_s6 }
0x1be3   :  { %v1777_v58 = vpop.permute.xlu1 %1776 }
0x1be4   :  { %v1779_v59 = vadd.f32 %v1777_v58, %v1769_v57 }
0x1be6   :  { %2746 = vtanh.f32 %v1779_v59 }
0x1bf3   :  { %v2747_v60 = vpop.eup %2746 }
0x1bf4   :  { %1782 = vrot.lane.b32.xlu0 %v2747_v60, %s2918_s3 }
0x1c66   :  { %v1783_v62 = vpop.permute.xlu0 %1782 }
0x1c67   :  { %v1785_v63 = vmul.f32 %v2745_v51, %v1783_v62 }
0x1c69   :  { %1787 = vrot.lane.b32.xlu1 %v1785_v63, %s2920_s6 }
0x1cdb   :  { %v1788_v1 = vpop.permute.xlu1 %1787 }
0x1cdc   :  { %2536 = vmatmul.mubr.msk.f32.vlgmr.msra.gmra.mxu1 %vm1103_vm2, %v1788_v1 }
0x1cdd   :  { %2550 = vmatpush3.msra.mxu1 %v3312_v37  ;;  %2557 = vmatprep.mubr.msk.f32.mxu1 %vm2919_vm1, %v2917_v0 }
0x1cde   :  { %2551 = vmatprep.subr.mxu1 %v2917_v0 }
0x1cdf   :  { %2552 = vmatpush3.msra.mxu1 %v3317_v41 }
0x1ce0   :  { %2553 = vmatprep.subr.mxu1 %v2917_v0 }
0x1ce1   :  { %2554 = vmatpush3.msra.mxu1 %v3326_v43 }
0x1ce2   :  { %2555 = vmatprep.subr.mxu1 %v2917_v0 }
0x1ce3   :  { %2556 = vmatpush3.msra.mxu1 %v3329_v46  ;;  %v1873_v46 = vrot.slane %v1779_v59, 6 }
0x1ce4   :  { %2579 = vmatprep.subr.mxu1 %v2917_v0 }
0x1d9c   :  { %v1857_v9 = vpop.f32.mrf.mxu1 }
0x1d9d   :  { %v1862_v11 = vrot.slane %v1857_v9, 6 }
0x1d9e   :  { %v2537_v37 = vpop.f32.mrf.mxu1 }
0x1d9f   :  { %v1864_v13 = vadd.f32 %v1862_v11, %v3381_v12 }
0x1da1   :  { %2748 = vtanh.f32 %v1864_v13  ;;  %v2375_v41 = vmul.f32 -1.442695, %v1864_v13 }
0x1da3   :  { %2750 = vpow2.f32 %v2375_v41 }
0x1dae   :  { %v2749_v38 = vpop.eup %2748 }
0x1daf   :  { %1877 = vrot.lane.b32.xlu0 %v2749_v38, %s2918_s3 }
0x1db0   :  { %v2751_v5 = vpop.eup %2750 }
0x1db1   :  { %v1868_v15 = vadd.f32 1.0, %v2751_v5 }
0x1db3   :  { %2752 = vrcp.f32 %v1868_v15 }
0x1dc0   :  { %v2753_v43 = vpop.eup %2752 }
0x1dc1   :  { %v1875_v23 = vmul.f32 %v2753_v43, %v1873_v46 }
0x1e21   :  { %v1878_v17 = vpop.permute.xlu0 %1877 }
0x1e22   :  { %v1880_v19 = vmul.f32 %v2753_v43, %v1878_v17 }
0x1e24   :  { %1882 = vrot.lane.b32.xlu1 %v1880_v19, %s2920_s6 }
0x1e96   :  { %v1883_v25 = vpop.permute.xlu1 %1882 }
0x1e97   :  { %v1885_v45 = vadd.f32 %v1883_v25, %v1875_v23 }
0x1e99   :  { %2754 = vtanh.f32 %v1885_v45  ;;  %v1980_v36 = vrot.slane %v1885_v45, 6 }
0x1ea6   :  { %v2755_v7 = vpop.eup %2754 }
0x1ea7   :  { %1888 = vrot.lane.b32.xlu0 %v2755_v7, %s2918_s3 }
0x1f19   :  { %v1889_v27 = vpop.permute.xlu0 %1888 }
0x1f1a   :  { %v1891_v4 = vmul.f32 %v2753_v43, %v1889_v27 }
0x1f1c   :  { %v1893_v6 = vrot.slane %v1891_v4, 2  ;;  %v2235_v4 = vld [vmem:[%s3550_s9 + $0x30] sm:$0xff] }
0x1f1e   :  { %1894 = vrot.lane.b32.xlu1 %v1893_v6, %s2920_s6  ;;  %v2234_v6 = vld [vmem:[%s3550_s9 + $0x28] sm:$0xff] }
0x1f90   :  { %v1895_v31 = vpop.permute.xlu1 %1894 }
0x1f91   :  { %2547 = vmatmul.mubr.msk.f32.vlgmr.msra.gmra.mxu0 %vm1103_vm2, %v1895_v31 }
0x1f92   :  { %2561 = vmatpush3.msra.mxu0 %v2113_v55  ;;  %2576 = vmatprep.mubr.msk.f32.mxu0 %vm2919_vm1, %v2917_v0  ;;  %v2233_v55 = vld [vmem:[%s3550_s9 + $0x20] sm:$0xff] }
0x1f93   :  { %2562 = vmatprep.subr.mxu0 %v2917_v0 }
0x1f94   :  { %2563 = vmatpush3.msra.mxu0 %v2112_v8  ;;  %v2232_v8 = vld [vmem:[%s3550_s9 + $0x18] sm:$0xff] }
0x1f95   :  { %2564 = vmatprep.subr.mxu0 %v2917_v0 }
0x1f96   :  { %2565 = vmatpush3.msra.mxu0 %v2111_v10 }
0x1f97   :  { %2566 = vmatprep.subr.mxu0 %v2917_v0 }
0x1f98   :  { %2567 = vmatpush3.msra.mxu0 %v2110_v14  ;;  %v2231_v14 = vld [vmem:[%s3550_s9 + $0x10] sm:$0xff] }
0x1f99   :  { %2568 = vmatprep.subr.mxu0 %v2917_v0 }
0x1f9a   :  { %2569 = vmatpush3.msra.mxu0 %v2109_v29 }
0x1f9b   :  { %2570 = vmatprep.subr.mxu0 %v2917_v0 }
0x1f9c   :  { %2571 = vmatpush3.msra.mxu0 %v2108_v18 }
0x1f9d   :  { %2572 = vmatprep.subr.mxu0 %v2917_v0 }
0x1f9e   :  { %2573 = vmatpush3.msra.mxu0 %v2107_v20  ;;  %v2230_v20 = vld [vmem:[%s3550_s9 + $0x8] sm:$0xff] }
0x1f9f   :  { %2574 = vmatprep.subr.mxu0 %v2917_v0 }
0x1fa0   :  { %2575 = vmatpush3.msra.mxu0 %v2106_v22  ;;  %v2229_v22 = vld [vmem:[%s3550_s9] sm:$0xff] }
0x1fa1   :  { %2577 = vmatmul.mubr.msk.f32.vlgmr.msra.gmra.mxu0 %vm137_vm0, %v2122_v24 }
0x2051   :  { %v1964_v26 = vpop.f32.mrf.mxu0 }
0x2052   :  { %v1969_v28 = vrot.slane %v1964_v26, 4 }
0x2053   :  { %v2548_v56 = vpop.f32.mrf.mxu0 }
0x2054   :  { %v1971_v61 = vadd.f32 %v1969_v28, %v3381_v12 }
0x2056   :  { %2756 = vtanh.f32 %v1971_v61  ;;  %v2377_v32 = vmul.f32 -1.442695, %v1971_v61 }
0x2058   :  { %2758 = vpow2.f32 %v2377_v32 }
0x2061   :  { %v2191_v44 = vpop.f32.mrf.mxu0 }
0x2062   :  { %v2192_v2 = vadd.f32 %v2380_v39, %v2191_v44 }
0x2063   :  { %v2757_v21 = vpop.eup %2756  ;;  %v2578_v30 = vpop.f32.mrf.mxu0 }
0x2064   :  { %1984 = vrot.lane.b32.xlu0 %v2757_v21, %s2918_s3  ;;  %v2382_v50 = vmul.f32 -1.442695, %v2192_v2  ;;  %v2383_v21 = vld [vmem:[%s3551_s10] ss:$0 sm:$0xff] }
0x2065   :  { %v2759_v33 = vpop.eup %2758 }
0x2066   :  { %v1975_v3 = vadd.f32 1.0, %v2759_v33 }
0x2068   :  { %2760 = vrcp.f32 %v1975_v3 }
0x2075   :  { %v2761_v16 = vpop.eup %2760 }
0x2076   :  { %v1982_v53 = vmul.f32 %v2761_v16, %v1980_v36 }
0x20d6   :  { %v1985_v34 = vpop.permute.xlu0 %1984 }
0x20d7   :  { %v1987_v35 = vmul.f32 %v2761_v16, %v1985_v34 }
0x20d9   :  { %1989 = vrot.lane.b32.xlu1 %v1987_v35, %s2920_s6 }
0x214b   :  { %v1990_v42 = vpop.permute.xlu1 %1989 }
0x214c   :  { %v1992_v48 = vadd.f32 %v1990_v42, %v1982_v53 }
0x214e   :  { %2762 = vtanh.f32 %v1992_v48  ;;  %v2087_v25 = vrot.slane %v1992_v48, 6 }
0x214f   :  { %2764 = vtanh.f32 %v2192_v2 }
0x2150   :  { %2766 = vpow2.f32 %v2382_v50 }
0x215b   :  { %v2763_v40 = vpop.eup %2762 }
0x215c   :  { %1995 = vrot.lane.b32.xlu0 %v2763_v40, %s2918_s3  ;;  %v2765_v49 = vpop.eup %2764 }
0x215d   :  { %v2767_v51 = vpop.eup %2766 }
0x215e   :  { %v2198_v47 = vadd.f32 1.0, %v2767_v51 }
0x2160   :  { %2204 = vrot.lane.b32.xlu0 %v2765_v49, %s2918_s3  ;;  %2768 = vrcp.f32 %v2198_v47 }
0x216d   :  { %v2769_v58 = vpop.eup %2768 }
0x216e   :  { %v2202_v63 = vmul.f32 0.0, %v2769_v58 }
0x21ce   :  { %v1996_v52 = vpop.permute.xlu0 %1995 }
0x21cf   :  { %v1998_v54 = vmul.f32 %v2761_v16, %v1996_v52 }
0x21d1   :  { %v2000_v57 = vrot.slane %v1998_v54, 4 }
0x21d2   :  { %v2205_v59 = vpop.permute.xlu0 %2204 }
0x21d3   :  { %v2207_v60 = vmul.f32 %v2769_v58, %v2205_v59  ;;  %2001 = vrot.lane.b32.xlu1 %v2000_v57, %s2920_s6 }
0x21d5   :  { %2209 = vrot.lane.b32.xlu0 %v2207_v60, %s2920_s6 }
0x2245   :  { %v2002_v62 = vpop.permute.xlu1 %2001 }
0x2246   :  { %2558 = vmatmul.mubr.msk.f32.vlgmr.msra.gmra.mxu1 %vm1103_vm2, %v2002_v62 }
0x2247   :  { %v2210_v1 = vpop.permute.xlu0 %2209  ;;  %2595 = vmatprep.mubr.msk.f32.mxu1 %vm2919_vm1, %v2917_v0 }
0x2248   :  { %v2212_v9 = vadd.f32 %v2210_v1, %v2202_v63 }
0x224a   :  { %2770 = vtanh.f32 %v2212_v9 }
0x2257   :  { %v2771_v11 = vpop.eup %2770 }
0x2258   :  { %2215 = vrot.lane.b32.xlu0 %v2771_v11, %s2918_s3 }
0x22ca   :  { %v2216_v31 = vpop.permute.xlu0 %2215 }
0x22cb   :  { %v2218_v10 = vmul.f32 %v2769_v58, %v2216_v31 }
0x22cd   :  { %v2224_v18 = vrot.slane %v2218_v10, 2 }
0x2306   :  { %v2071_v37 = vpop.f32.mrf.mxu1 }
0x2307   :  { %v2076_v13 = vrot.slane %v2071_v37, 2 }
0x2308   :  { %v2559_v38 = vpop.f32.mrf.mxu1 }
0x2309   :  { %v2078_v41 = vadd.f32 %v2076_v13, %v3381_v12  ;;  %v2236_v12 = vld [vmem:[%s3550_s9 + $0x38] sm:$0xff]  ;;  %s2326_s9 = sshll.u32 %s2921_s15, 4  ;;  %s2327_s9 = int_to_ptr.vmem [resolvable:$true] %s2326_s9 }
0x230a   :  { %2580 = vmatpush3.msra.mxu1 %v2236_v12  ;;  %s2880_s16 = scalar_lea.vmem %s2327_s9, 32  ;;  %p2885_p12 = scmp.lt.s32.totalorder %s2327_s9, %s2327_s9 }
0x230b   :  { %2772 = vtanh.f32 %v2078_v41  ;;  %v2379_v15 = vmul.f32 -1.442695, %v2078_v41  ;;  %2581 = vmatprep.subr.mxu1 %v2917_v0  ;;  %p2881_p11 = scmp.ne.s32.totalorder %s2327_s9, %s2880_s16  ;;  %p2886_p13 = scmp.lt.s32.totalorder %s2880_s16, %s2880_s16 }
0x230c   :  { %2582 = vmatpush3.msra.mxu1 %v2235_v4 }
0x230d   :  { %2774 = vpow2.f32 %v2379_v15  ;;  %2583 = vmatprep.subr.mxu1 %v2917_v0  ;;  %p2887_p0 = por %p2886_p13, %p2885_p12 }
0x230e   :  { %2584 = vmatpush3.msra.mxu1 %v2234_v6 }
0x230f   :  { %2585 = vmatprep.subr.mxu1 %v2917_v0  ;;  %p2888_p1 = pnand %p2887_p0, %p2881_p11 }
0x2310   :  { %2586 = vmatpush3.msra.mxu1 %v2233_v55 }
0x2311   :  { %2587 = vmatprep.subr.mxu1 %v2917_v0 }
0x2312   :  { %2588 = vmatpush3.msra.mxu1 %v2232_v8 }
0x2313   :  { %2589 = vmatprep.subr.mxu1 %v2917_v0 }
0x2314   :  { %2590 = vmatpush3.msra.mxu1 %v2231_v14 }
0x2315   :  { %2591 = vmatprep.subr.mxu1 %v2917_v0 }
0x2316   :  { %2592 = vmatpush3.msra.mxu1 %v2230_v20 }
0x2317   :  { %2593 = vmatprep.subr.mxu1 %v2917_v0 }
0x2318   :  { %v2773_v5 = vpop.eup %2772  ;;  %2594 = vmatpush3.msra.mxu1 %v2229_v22 }
0x2319   :  { %2091 = vrot.lane.b32.xlu1 %v2773_v5, %s2918_s3 }
0x231a   :  { %v2775_v43 = vpop.eup %2774 }
0x231b   :  { %v2082_v17 = vadd.f32 1.0, %v2775_v43 }
0x231d   :  { %2776 = vrcp.f32 %v2082_v17 }
0x232a   :  { %v2777_v19 = vpop.eup %2776 }
0x232b   :  { %v2089_v45 = vmul.f32 %v2777_v19, %v2087_v25 }
0x238b   :  { %v2092_v46 = vpop.permute.xlu1 %2091 }
0x238c   :  { %v2094_v23 = vmul.f32 %v2777_v19, %v2092_v46 }
0x238e   :  { %2096 = vrot.lane.b32.xlu1 %v2094_v23, %s2920_s6 }
0x2400   :  { %v2097_v7 = vpop.permute.xlu1 %2096 }
0x2401   :  { %v2099_v27 = vadd.f32 %v2097_v7, %v2089_v45 }
0x2403   :  { %2778 = vtanh.f32 %v2099_v27 }
0x2410   :  { %v2779_v29 = vpop.eup %2778 }
0x2411   :  { %2102 = vrot.lane.b32.xlu1 %v2779_v29, %s2918_s3 }
0x2415   :  { %2225 = vrot.lane.b32.xlu1 %v2224_v18, %s2918_s3 }
0x2483   :  { %v2103_v24 = vpop.permute.xlu1 %2102 }
0x2484   :  { %v2105_v26 = vmul.f32 %v2777_v19, %v2103_v24 }
0x2486   :  { %2220 = vrot.lane.b32.xlu0 %v2105_v26, %s2920_s6 }
0x2487   :  { %v2226_v28 = vpop.permute.xlu1 %2225 }
0x24f8   :  { %v2221_v56 = vpop.permute.xlu0 %2220 }
0x24f9   :  { %v2228_v61 = vsel %vm1103_vm2, %v2221_v56, %v2226_v28 }
0x24fa   :  { %v2245_v44 = vrot.slane %v2228_v61, 6 }
0x24fc   :  { %2596 = vmatmul.mubr.msk.f32.vlgmr.msra.gmra.mxu1 %vm137_vm0, %v2245_v44 }
0x25bc   :  { %v2314_v30 = vpop.f32.mrf.mxu1 }
0x25bd   :  { %v2315_v0 = vadd.f32 %v2383_v21, %v2314_v30 }
0x25be   :  { %v2597_v32 = vpop.f32.mrf.mxu1 }
0x25bf   :  { %2319 = vst.msk [vmem:[#allocation11] sm:$0x3] %vm2318_vm6, %v2315_v0 }
0x25c0   :  { %2891 = shalt.err (!%p2888_p1)
}
0x25c1   :  { %2329 = dma.vmem_to_hbm [thread:$0]  %s2327_s9, 32, %s3552_s11, [#allocation4]  }
0x25c2   :  { %2906 = dma.done.wait [#allocation4], 32  }
0x25c3   :  { %2907 = vsyncadd [#allocation4], 4294967264 }
0x25c4   :  { %2333 = vsyncpa [#allocation3], 1 }
0x25c5   :  { %2334 = vsyncpa [#allocation6], 1 }
0x25c6   :  { %2335 = vsyncpa [#allocation9], 1 }
0x25c7   :  { %2336 = vsyncpa [#allocation4], 1 }

</bundles_post_ra>
